<compile_context>
chip_gen: v7x
topology: tpu7x:2x2x1
jax: 0.10.0
libtpu: 0.0.40
codegen_flags: <defaults>
</compile_context>

<pallas_src>
import functools
import math

import jax
import jax.numpy as jnp
from jax.experimental import pallas as pl
from jax.experimental.pallas import tpu as pltpu


def _round_up(x, m):
    return ((x + m - 1) // m) * m


# ------------- kernel 1: per-tile BN partial statistics (no lin output) ------

def _stats_kernel(x_ref, w_ref, b_ref, psum_ref, psumsq_ref, *, tkk, kk_valid, t):
    i = pl.program_id(0)
    w = w_ref[...]                      # (cin, up) bf16
    b = b_ref[...]                      # (1, up)  f32

    def accum(valid):
        s = jnp.zeros_like(b)
        sq = jnp.zeros_like(b)
        for j in range(t):              # static unroll, T == 10
            lin = jnp.dot(x_ref[j], w, preferred_element_type=jnp.float32) + b
            if valid is not None:
                lin = lin * valid
            s = s + jnp.sum(lin, axis=0, keepdims=True)
            sq = sq + jnp.sum(lin * lin, axis=0, keepdims=True)
        psum_ref[...] = s[None, :, :]
        psumsq_ref[...] = sq[None, :, :]

    last = pl.num_programs(0) - 1

    @pl.when(i != last)
    def _():                            # interior tiles: no padded voxels
        accum(None)

    @pl.when(i == last)
    def _():                            # last tile: drop padded voxels from the stats
        vox = i * tkk + jax.lax.broadcasted_iota(jnp.int32, (tkk, 1), 0)
        accum((vox < kk_valid).astype(jnp.float32))


# -- kernel 2: Linear + folded-BN affine + ReLU + voxel max over T + mask -----
#    (single merged output: lanes [0,units)=pwf, [units,2*units)=laf)

def _apply_kernel(x_ref, w_ref, scale_ref, shift_ref, mask_ref, out_ref, *, units, t):
    w = w_ref[...]                      # (cin, up) bf16; cols [units,2u) duplicate [0,u)
    scale = scale_ref[...]              # (1, up) f32
    shift = shift_ref[...]              # (1, up) f32 (Linear bias folded in)

    laf = None
    for j in range(t):                  # static unroll over T
        lin = jnp.dot(x_ref[j], w, preferred_element_type=jnp.float32)   # (tkk, up)
        pwf = jnp.maximum(lin * scale + shift, 0.0)
        out_ref[j] = pwf                                     # park pwf in the VMEM out block
        laf = pwf if laf is None else jnp.maximum(laf, pwf)  # per-voxel max over T (VPU only)

    lane = jax.lax.broadcasted_iota(jnp.int32, laf.shape, 1)
    is_pw = lane < units                # duplicated columns => laf lanes already aligned
    for j in range(t):
        out_ref[j] = jnp.where(is_pw, out_ref[j], laf) * mask_ref[j]


# ---------------------------------- wrapper ----------------------------------

def vfe_forward(x, mask, weight, bias, gamma, beta, *, eps=1e-5, tkk=256):
    """VFE forward.

    x      : (KK, T, cin) float32        mask : (KK, T) bool/float
    weight : (units, cin), bias/gamma/beta : (units,)   (units = cout // 2)
    Returns (KK, T, 2*units) float32.
    """
    kk, t, cin = x.shape
    units = weight.shape[0]
    assert t == 10, "VFE hard-codes repeat(1, 10, 1); T must be 10"

    up = _round_up(2 * units, 128)               # lane-dense merged feature dim
    tkk_eff = _round_up(min(tkk, kk), 8)
    kk_pad = _round_up(kk, tkk_eff)
    num_tiles = kk_pad // tkk_eff

    # ---- pad / layout x once up front: time-major (T, KK_pad, cin) bf16 ----
    x_t = jnp.transpose(x.astype(jnp.float32), (1, 0, 2))
    if kk_pad != kk:
        x_t = jnp.pad(x_t, ((0, 0), (0, kk_pad - kk), (0, 0)))
    x_t = x_t.astype(jnp.bfloat16)

    # ---- parameters, duplicated into lanes [units, 2*units) ----
    wt = weight.T.astype(jnp.float32)            # (cin, units)
    w2d = jnp.zeros((cin, up), jnp.float32)
    w2d = w2d.at[:, :units].set(wt).at[:, units:2 * units].set(wt)
    w2d = w2d.astype(jnp.bfloat16)

    def _dup(v):
        out = jnp.zeros((up,), jnp.float32)
        v = v.astype(jnp.float32)
        return out.at[:units].set(v).at[units:2 * units].set(v)

    b_p = _dup(bias)
    gamma_p = _dup(gamma)
    beta_p = _dup(beta)
    b2d = b_p.reshape(1, up)

    mask_t = jnp.transpose(mask.astype(jnp.float32), (1, 0))
    if kk_pad != kk:
        mask_t = jnp.pad(mask_t, ((0, 0), (0, kk_pad - kk)))
    mask_t = mask_t[:, :, None]                  # (T, KK_pad, 1)

    cparams = pltpu.CompilerParams(
        dimension_semantics=("parallel",),
        vmem_limit_bytes=32 * 1024 * 1024,
    )

    x_spec = pl.BlockSpec((t, tkk_eff, cin), lambda i: (0, i, 0))
    w_spec = pl.BlockSpec((cin, up), lambda i: (0, 0))
    row_spec = pl.BlockSpec((1, up), lambda i: (0, 0))

    # ---- kernel 1: BN partial statistics (tiny outputs only, no lin) ----
    psum, psumsq = pl.pallas_call(
        functools.partial(_stats_kernel, tkk=tkk_eff, kk_valid=kk, t=t),
        out_shape=(
            jax.ShapeDtypeStruct((num_tiles, 1, up), jnp.float32),
            jax.ShapeDtypeStruct((num_tiles, 1, up), jnp.float32),
        ),
        grid=(num_tiles,),
        in_specs=[x_spec, w_spec, row_spec],
        out_specs=(
            pl.BlockSpec((1, 1, up), lambda i: (i, 0, 0)),
            pl.BlockSpec((1, 1, up), lambda i: (i, 0, 0)),
        ),
        compiler_params=cparams,
    )(x_t, w2d, b2d)

    # ---- tiny cross-tile stat combine + BN fold (plain JAX glue, O(up)) ----
    count = float(kk * t)
    ssum = jnp.sum(psum, axis=(0, 1))                       # (up,)
    ssq = jnp.sum(psumsq, axis=(0, 1))                      # (up,)
    mean = ssum / count
    var = jnp.maximum(ssq / count - mean * mean, 0.0)       # biased (training-mode BN)
    inv = gamma_p / jnp.sqrt(var + eps)
    scale = inv.reshape(1, up)
    shift = (beta_p - mean * inv + b_p * inv).reshape(1, up)   # Linear bias folded in

    # ---- kernel 2: Linear + BN affine + ReLU + voxel max + mask, merged out ----
    out_t = pl.pallas_call(
        functools.partial(_apply_kernel, units=units, t=t),
        out_shape=jax.ShapeDtypeStruct((t, kk_pad, up), jnp.float32),
        grid=(num_tiles,),
        in_specs=[
            x_spec,
            w_spec,
            row_spec,                                  # scale
            row_spec,                                  # shift
            pl.BlockSpec((t, tkk_eff, 1), lambda i: (0, i, 0)),   # mask
        ],
        out_specs=pl.BlockSpec((t, tkk_eff, up), lambda i: (0, i, 0)),
        compiler_params=cparams,
    )(x_t, w2d, scale, shift, mask_t)

    # ---- one layout pass at the end: slice padding off and go voxel-major ----
    return jnp.transpose(out_t[:, :kk, :2 * units], (1, 0, 2))


if __name__ == "__main__":
    KK, T, CIN, COUT = 20, 10, 7, 32
    UNITS = COUT // 2

    key = jax.random.PRNGKey(0)
    kx, km, kw, kb, kg, kbe = jax.random.split(key, 6)

    x = jax.random.normal(kx, (KK, T, CIN), jnp.float32)
    mask = jax.random.uniform(km, (KK, T)) > 0.3

    # PyTorch-style Linear init (kaiming-uniform bound), non-trivial BN affine
    bound = 1.0 / math.sqrt(CIN)
    weight = jax.random.uniform(kw, (UNITS, CIN), jnp.float32, -bound, bound)
    bias = jax.random.uniform(kb, (UNITS,), jnp.float32, -bound, bound)
    gamma = 1.0 + 0.1 * jax.random.normal(kg, (UNITS,), jnp.float32)
    beta = 0.1 * jax.random.normal(kbe, (UNITS,), jnp.float32)

    fwd = jax.jit(lambda x, mk, w, b, g, be: vfe_forward(x, mk, w, b, g, be))
    out = jax.block_until_ready(fwd(x, mask, weight, bias, gamma, beta))

    # ---- plain-JAX reference (same bf16 quantization of matmul operands) ----
    xq = x.astype(jnp.bfloat16).astype(jnp.float32)
    wq = weight.astype(jnp.bfloat16).astype(jnp.float32)
    lin = xq.reshape(KK * T, CIN) @ wq.T + bias
    mean = lin.mean(axis=0)
    var = lin.var(axis=0)                       # biased, training-mode BN
    pwf = jnp.maximum((lin - mean) / jnp.sqrt(var + 1e-5) * gamma + beta, 0.0)
    pwf = pwf.reshape(KK, T, UNITS)
    laf = jnp.broadcast_to(jnp.max(pwf, axis=1, keepdims=True), pwf.shape)
    ref = jnp.concatenate([pwf, laf], axis=-1) * mask[:, :, None].astype(jnp.float32)

    assert out.shape == ref.shape == (KK, T, COUT)
    err = float(jnp.abs(out - ref).max())
    assert jnp.allclose(out, ref, atol=2e-3, rtol=2e-3), err

    print("KERNEL_OK")
</pallas_src>

<mosaic_0001>
module attributes {stable_mosaic.version = 11 : i64} {
  func.func @_stats_kernel(%arg0: i32, %arg1: memref<10x24x7xbf16, #tpu.memory_space<vmem>>, %arg2: memref<7x128xbf16, #tpu.memory_space<vmem>>, %arg3: memref<1x128xf32, #tpu.memory_space<vmem>>, %arg4: memref<1x1x128xf32, #tpu.memory_space<vmem>>, %arg5: memref<1x1x128xf32, #tpu.memory_space<vmem>>) attributes {dimension_semantics = [#tpu.dimension_semantics<parallel>], iteration_bounds = array<i64: 1>, scalar_prefetch = 0 : i64, scratch_operands = 0 : i64, tpu.core_type = #tpu.core_type<tc>, window_params = [{transform_indices = @transform_0, window_bounds = array<i64: 10, 24, 7>}, {pipeline_mode = #tpu.pipeline_mode<synchronous>, transform_indices = @transform_1, window_bounds = array<i64: 7, 128>}, {pipeline_mode = #tpu.pipeline_mode<synchronous>, transform_indices = @transform_2, window_bounds = array<i64: 1, 128>}, {transform_indices = @transform_3, window_bounds = array<i64: 1, 1, 128>}, {transform_indices = @transform_4, window_bounds = array<i64: 1, 1, 128>}]} {
    %c0 = arith.constant 0 : index
    %c0_0 = arith.constant 0 : index
    %0 = vector.load %arg2[%c0, %c0_0] : memref<7x128xbf16, #tpu.memory_space<vmem>>, vector<7x128xbf16>
    %c0_1 = arith.constant 0 : index
    %c0_2 = arith.constant 0 : index
    %1 = vector.load %arg3[%c0_1, %c0_2] : memref<1x128xf32, #tpu.memory_space<vmem>>, vector<1x128xf32>
    %c0_i32 = arith.constant 0 : i32
    %2 = arith.cmpi ne, %arg0, %c0_i32 : i32
    %3 = arith.extui %2 : i1 to i32
    %c0_i32_3 = arith.constant 0 : i32
    %4 = arith.cmpi ne, %3, %c0_i32_3 : i32
    scf.if %4 {
      %cst = arith.constant 0.000000e+00 : f32
      %8 = vector.broadcast %cst : f32 to vector<1x128xf32>
      %cst_6 = arith.constant 0.000000e+00 : f32
      %9 = vector.broadcast %cst_6 : f32 to vector<1x128xf32>
      %c0_7 = arith.constant 0 : index
      %c0_8 = arith.constant 0 : index
      %c0_9 = arith.constant 0 : index
      %10 = vector.load %arg1[%c0_7, %c0_8, %c0_9] : memref<10x24x7xbf16, #tpu.memory_space<vmem>>, vector<1x24x7xbf16>
      %11 = vector.shape_cast %10 : vector<1x24x7xbf16> to vector<24x7xbf16>
      %cst_10 = arith.constant dense<0.000000e+00> : vector<24x128xf32>
      %12 = tpu.matmul %11, %0, %cst_10 {dimension_numbers = #tpu.dot_dimension_numbers<[1], [0], [0], [1], [0, 0, 1, 1], [], []>} : vector<24x7xbf16>, vector<7x128xbf16>, vector<24x128xf32> -> vector<24x128xf32>
      %13 = vector.broadcast %1 : vector<1x128xf32> to vector<24x128xf32>
      %14 = arith.addf %12, %13 : vector<24x128xf32>
      %cst_11 = arith.constant dense<0.000000e+00> : vector<128xf32>
      %15 = vector.multi_reduction <add>, %14, %cst_11 [0] : vector<24x128xf32> to vector<128xf32>
      %16 = vector.shape_cast %15 : vector<128xf32> to vector<1x128xf32>
      %17 = arith.addf %8, %16 : vector<1x128xf32>
      %18 = arith.mulf %14, %14 : vector<24x128xf32>
      %cst_12 = arith.constant dense<0.000000e+00> : vector<128xf32>
      %19 = vector.multi_reduction <add>, %18, %cst_12 [0] : vector<24x128xf32> to vector<128xf32>
      %20 = vector.shape_cast %19 : vector<128xf32> to vector<1x128xf32>
      %21 = arith.addf %9, %20 : vector<1x128xf32>
      %c1 = arith.constant 1 : index
      %c0_13 = arith.constant 0 : index
      %c0_14 = arith.constant 0 : index
      %22 = vector.load %arg1[%c1, %c0_13, %c0_14] : memref<10x24x7xbf16, #tpu.memory_space<vmem>>, vector<1x24x7xbf16>
      %23 = vector.shape_cast %22 : vector<1x24x7xbf16> to vector<24x7xbf16>
      %cst_15 = arith.constant dense<0.000000e+00> : vector<24x128xf32>
      %24 = tpu.matmul %23, %0, %cst_15 {dimension_numbers = #tpu.dot_dimension_numbers<[1], [0], [0], [1], [0, 0, 1, 1], [], []>} : vector<24x7xbf16>, vector<7x128xbf16>, vector<24x128xf32> -> vector<24x128xf32>
      %25 = vector.broadcast %1 : vector<1x128xf32> to vector<24x128xf32>
      %26 = arith.addf %24, %25 : vector<24x128xf32>
      %cst_16 = arith.constant dense<0.000000e+00> : vector<128xf32>
      %27 = vector.multi_reduction <add>, %26, %cst_16 [0] : vector<24x128xf32> to vector<128xf32>
      %28 = vector.shape_cast %27 : vector<128xf32> to vector<1x128xf32>
      %29 = arith.addf %17, %28 : vector<1x128xf32>
      %30 = arith.mulf %26, %26 : vector<24x128xf32>
      %cst_17 = arith.constant dense<0.000000e+00> : vector<128xf32>
      %31 = vector.multi_reduction <add>, %30, %cst_17 [0] : vector<24x128xf32> to vector<128xf32>
      %32 = vector.shape_cast %31 : vector<128xf32> to vector<1x128xf32>
      %33 = arith.addf %21, %32 : vector<1x128xf32>
      %c2 = arith.constant 2 : index
      %c0_18 = arith.constant 0 : index
      %c0_19 = arith.constant 0 : index
      %34 = vector.load %arg1[%c2, %c0_18, %c0_19] : memref<10x24x7xbf16, #tpu.memory_space<vmem>>, vector<1x24x7xbf16>
      %35 = vector.shape_cast %34 : vector<1x24x7xbf16> to vector<24x7xbf16>
      %cst_20 = arith.constant dense<0.000000e+00> : vector<24x128xf32>
      %36 = tpu.matmul %35, %0, %cst_20 {dimension_numbers = #tpu.dot_dimension_numbers<[1], [0], [0], [1], [0, 0, 1, 1], [], []>} : vector<24x7xbf16>, vector<7x128xbf16>, vector<24x128xf32> -> vector<24x128xf32>
      %37 = vector.broadcast %1 : vector<1x128xf32> to vector<24x128xf32>
      %38 = arith.addf %36, %37 : vector<24x128xf32>
      %cst_21 = arith.constant dense<0.000000e+00> : vector<128xf32>
      %39 = vector.multi_reduction <add>, %38, %cst_21 [0] : vector<24x128xf32> to vector<128xf32>
      %40 = vector.shape_cast %39 : vector<128xf32> to vector<1x128xf32>
      %41 = arith.addf %29, %40 : vector<1x128xf32>
      %42 = arith.mulf %38, %38 : vector<24x128xf32>
      %cst_22 = arith.constant dense<0.000000e+00> : vector<128xf32>
      %43 = vector.multi_reduction <add>, %42, %cst_22 [0] : vector<24x128xf32> to vector<128xf32>
      %44 = vector.shape_cast %43 : vector<128xf32> to vector<1x128xf32>
      %45 = arith.addf %33, %44 : vector<1x128xf32>
      %c3 = arith.constant 3 : index
      %c0_23 = arith.constant 0 : index
      %c0_24 = arith.constant 0 : index
      %46 = vector.load %arg1[%c3, %c0_23, %c0_24] : memref<10x24x7xbf16, #tpu.memory_space<vmem>>, vector<1x24x7xbf16>
      %47 = vector.shape_cast %46 : vector<1x24x7xbf16> to vector<24x7xbf16>
      %cst_25 = arith.constant dense<0.000000e+00> : vector<24x128xf32>
      %48 = tpu.matmul %47, %0, %cst_25 {dimension_numbers = #tpu.dot_dimension_numbers<[1], [0], [0], [1], [0, 0, 1, 1], [], []>} : vector<24x7xbf16>, vector<7x128xbf16>, vector<24x128xf32> -> vector<24x128xf32>
      %49 = vector.broadcast %1 : vector<1x128xf32> to vector<24x128xf32>
      %50 = arith.addf %48, %49 : vector<24x128xf32>
      %cst_26 = arith.constant dense<0.000000e+00> : vector<128xf32>
      %51 = vector.multi_reduction <add>, %50, %cst_26 [0] : vector<24x128xf32> to vector<128xf32>
      %52 = vector.shape_cast %51 : vector<128xf32> to vector<1x128xf32>
      %53 = arith.addf %41, %52 : vector<1x128xf32>
      %54 = arith.mulf %50, %50 : vector<24x128xf32>
      %cst_27 = arith.constant dense<0.000000e+00> : vector<128xf32>
      %55 = vector.multi_reduction <add>, %54, %cst_27 [0] : vector<24x128xf32> to vector<128xf32>
      %56 = vector.shape_cast %55 : vector<128xf32> to vector<1x128xf32>
      %57 = arith.addf %45, %56 : vector<1x128xf32>
      %c4 = arith.constant 4 : index
      %c0_28 = arith.constant 0 : index
      %c0_29 = arith.constant 0 : index
      %58 = vector.load %arg1[%c4, %c0_28, %c0_29] : memref<10x24x7xbf16, #tpu.memory_space<vmem>>, vector<1x24x7xbf16>
      %59 = vector.shape_cast %58 : vector<1x24x7xbf16> to vector<24x7xbf16>
      %cst_30 = arith.constant dense<0.000000e+00> : vector<24x128xf32>
      %60 = tpu.matmul %59, %0, %cst_30 {dimension_numbers = #tpu.dot_dimension_numbers<[1], [0], [0], [1], [0, 0, 1, 1], [], []>} : vector<24x7xbf16>, vector<7x128xbf16>, vector<24x128xf32> -> vector<24x128xf32>
      %61 = vector.broadcast %1 : vector<1x128xf32> to vector<24x128xf32>
      %62 = arith.addf %60, %61 : vector<24x128xf32>
      %cst_31 = arith.constant dense<0.000000e+00> : vector<128xf32>
      %63 = vector.multi_reduction <add>, %62, %cst_31 [0] : vector<24x128xf32> to vector<128xf32>
      %64 = vector.shape_cast %63 : vector<128xf32> to vector<1x128xf32>
      %65 = arith.addf %53, %64 : vector<1x128xf32>
      %66 = arith.mulf %62, %62 : vector<24x128xf32>
      %cst_32 = arith.constant dense<0.000000e+00> : vector<128xf32>
      %67 = vector.multi_reduction <add>, %66, %cst_32 [0] : vector<24x128xf32> to vector<128xf32>
      %68 = vector.shape_cast %67 : vector<128xf32> to vector<1x128xf32>
      %69 = arith.addf %57, %68 : vector<1x128xf32>
      %c5 = arith.constant 5 : index
      %c0_33 = arith.constant 0 : index
      %c0_34 = arith.constant 0 : index
      %70 = vector.load %arg1[%c5, %c0_33, %c0_34] : memref<10x24x7xbf16, #tpu.memory_space<vmem>>, vector<1x24x7xbf16>
      %71 = vector.shape_cast %70 : vector<1x24x7xbf16> to vector<24x7xbf16>
      %cst_35 = arith.constant dense<0.000000e+00> : vector<24x128xf32>
      %72 = tpu.matmul %71, %0, %cst_35 {dimension_numbers = #tpu.dot_dimension_numbers<[1], [0], [0], [1], [0, 0, 1, 1], [], []>} : vector<24x7xbf16>, vector<7x128xbf16>, vector<24x128xf32> -> vector<24x128xf32>
      %73 = vector.broadcast %1 : vector<1x128xf32> to vector<24x128xf32>
      %74 = arith.addf %72, %73 : vector<24x128xf32>
      %cst_36 = arith.constant dense<0.000000e+00> : vector<128xf32>
      %75 = vector.multi_reduction <add>, %74, %cst_36 [0] : vector<24x128xf32> to vector<128xf32>
      %76 = vector.shape_cast %75 : vector<128xf32> to vector<1x128xf32>
      %77 = arith.addf %65, %76 : vector<1x128xf32>
      %78 = arith.mulf %74, %74 : vector<24x128xf32>
      %cst_37 = arith.constant dense<0.000000e+00> : vector<128xf32>
      %79 = vector.multi_reduction <add>, %78, %cst_37 [0] : vector<24x128xf32> to vector<128xf32>
      %80 = vector.shape_cast %79 : vector<128xf32> to vector<1x128xf32>
      %81 = arith.addf %69, %80 : vector<1x128xf32>
      %c6 = arith.constant 6 : index
      %c0_38 = arith.constant 0 : index
      %c0_39 = arith.constant 0 : index
      %82 = vector.load %arg1[%c6, %c0_38, %c0_39] : memref<10x24x7xbf16, #tpu.memory_space<vmem>>, vector<1x24x7xbf16>
      %83 = vector.shape_cast %82 : vector<1x24x7xbf16> to vector<24x7xbf16>
      %cst_40 = arith.constant dense<0.000000e+00> : vector<24x128xf32>
      %84 = tpu.matmul %83, %0, %cst_40 {dimension_numbers = #tpu.dot_dimension_numbers<[1], [0], [0], [1], [0, 0, 1, 1], [], []>} : vector<24x7xbf16>, vector<7x128xbf16>, vector<24x128xf32> -> vector<24x128xf32>
      %85 = vector.broadcast %1 : vector<1x128xf32> to vector<24x128xf32>
      %86 = arith.addf %84, %85 : vector<24x128xf32>
      %cst_41 = arith.constant dense<0.000000e+00> : vector<128xf32>
      %87 = vector.multi_reduction <add>, %86, %cst_41 [0] : vector<24x128xf32> to vector<128xf32>
      %88 = vector.shape_cast %87 : vector<128xf32> to vector<1x128xf32>
      %89 = arith.addf %77, %88 : vector<1x128xf32>
      %90 = arith.mulf %86, %86 : vector<24x128xf32>
      %cst_42 = arith.constant dense<0.000000e+00> : vector<128xf32>
      %91 = vector.multi_reduction <add>, %90, %cst_42 [0] : vector<24x128xf32> to vector<128xf32>
      %92 = vector.shape_cast %91 : vector<128xf32> to vector<1x128xf32>
      %93 = arith.addf %81, %92 : vector<1x128xf32>
      %c7 = arith.constant 7 : index
      %c0_43 = arith.constant 0 : index
      %c0_44 = arith.constant 0 : index
      %94 = vector.load %arg1[%c7, %c0_43, %c0_44] : memref<10x24x7xbf16, #tpu.memory_space<vmem>>, vector<1x24x7xbf16>
      %95 = vector.shape_cast %94 : vector<1x24x7xbf16> to vector<24x7xbf16>
      %cst_45 = arith.constant dense<0.000000e+00> : vector<24x128xf32>
      %96 = tpu.matmul %95, %0, %cst_45 {dimension_numbers = #tpu.dot_dimension_numbers<[1], [0], [0], [1], [0, 0, 1, 1], [], []>} : vector<24x7xbf16>, vector<7x128xbf16>, vector<24x128xf32> -> vector<24x128xf32>
      %97 = vector.broadcast %1 : vector<1x128xf32> to vector<24x128xf32>
      %98 = arith.addf %96, %97 : vector<24x128xf32>
      %cst_46 = arith.constant dense<0.000000e+00> : vector<128xf32>
      %99 = vector.multi_reduction <add>, %98, %cst_46 [0] : vector<24x128xf32> to vector<128xf32>
      %100 = vector.shape_cast %99 : vector<128xf32> to vector<1x128xf32>
      %101 = arith.addf %89, %100 : vector<1x128xf32>
      %102 = arith.mulf %98, %98 : vector<24x128xf32>
      %cst_47 = arith.constant dense<0.000000e+00> : vector<128xf32>
      %103 = vector.multi_reduction <add>, %102, %cst_47 [0] : vector<24x128xf32> to vector<128xf32>
      %104 = vector.shape_cast %103 : vector<128xf32> to vector<1x128xf32>
      %105 = arith.addf %93, %104 : vector<1x128xf32>
      %c8 = arith.constant 8 : index
      %c0_48 = arith.constant 0 : index
      %c0_49 = arith.constant 0 : index
      %106 = vector.load %arg1[%c8, %c0_48, %c0_49] : memref<10x24x7xbf16, #tpu.memory_space<vmem>>, vector<1x24x7xbf16>
      %107 = vector.shape_cast %106 : vector<1x24x7xbf16> to vector<24x7xbf16>
      %cst_50 = arith.constant dense<0.000000e+00> : vector<24x128xf32>
      %108 = tpu.matmul %107, %0, %cst_50 {dimension_numbers = #tpu.dot_dimension_numbers<[1], [0], [0], [1], [0, 0, 1, 1], [], []>} : vector<24x7xbf16>, vector<7x128xbf16>, vector<24x128xf32> -> vector<24x128xf32>
      %109 = vector.broadcast %1 : vector<1x128xf32> to vector<24x128xf32>
      %110 = arith.addf %108, %109 : vector<24x128xf32>
      %cst_51 = arith.constant dense<0.000000e+00> : vector<128xf32>
      %111 = vector.multi_reduction <add>, %110, %cst_51 [0] : vector<24x128xf32> to vector<128xf32>
      %112 = vector.shape_cast %111 : vector<128xf32> to vector<1x128xf32>
      %113 = arith.addf %101, %112 : vector<1x128xf32>
      %114 = arith.mulf %110, %110 : vector<24x128xf32>
      %cst_52 = arith.constant dense<0.000000e+00> : vector<128xf32>
      %115 = vector.multi_reduction <add>, %114, %cst_52 [0] : vector<24x128xf32> to vector<128xf32>
      %116 = vector.shape_cast %115 : vector<128xf32> to vector<1x128xf32>
      %117 = arith.addf %105, %116 : vector<1x128xf32>
      %c9 = arith.constant 9 : index
      %c0_53 = arith.constant 0 : index
      %c0_54 = arith.constant 0 : index
      %118 = vector.load %arg1[%c9, %c0_53, %c0_54] : memref<10x24x7xbf16, #tpu.memory_space<vmem>>, vector<1x24x7xbf16>
      %119 = vector.shape_cast %118 : vector<1x24x7xbf16> to vector<24x7xbf16>
      %cst_55 = arith.constant dense<0.000000e+00> : vector<24x128xf32>
      %120 = tpu.matmul %119, %0, %cst_55 {dimension_numbers = #tpu.dot_dimension_numbers<[1], [0], [0], [1], [0, 0, 1, 1], [], []>} : vector<24x7xbf16>, vector<7x128xbf16>, vector<24x128xf32> -> vector<24x128xf32>
      %121 = vector.broadcast %1 : vector<1x128xf32> to vector<24x128xf32>
      %122 = arith.addf %120, %121 : vector<24x128xf32>
      %cst_56 = arith.constant dense<0.000000e+00> : vector<128xf32>
      %123 = vector.multi_reduction <add>, %122, %cst_56 [0] : vector<24x128xf32> to vector<128xf32>
      %124 = vector.shape_cast %123 : vector<128xf32> to vector<1x128xf32>
      %125 = arith.addf %113, %124 : vector<1x128xf32>
      %126 = arith.mulf %122, %122 : vector<24x128xf32>
      %cst_57 = arith.constant dense<0.000000e+00> : vector<128xf32>
      %127 = vector.multi_reduction <add>, %126, %cst_57 [0] : vector<24x128xf32> to vector<128xf32>
      %128 = vector.shape_cast %127 : vector<128xf32> to vector<1x128xf32>
      %129 = arith.addf %117, %128 : vector<1x128xf32>
      %130 = vector.shape_cast %125 : vector<1x128xf32> to vector<1x1x128xf32>
      %c0_58 = arith.constant 0 : index
      %c0_59 = arith.constant 0 : index
      %c0_60 = arith.constant 0 : index
      %131 = vector.load %arg4[%c0_58, %c0_59, %c0_60] : memref<1x1x128xf32, #tpu.memory_space<vmem>>, vector<1x1x128xf32>
      tpu.vector_store %arg4[%c0_58, %c0_59, %c0_60], %130 {strides = array<i32>} : memref<1x1x128xf32, #tpu.memory_space<vmem>>, vector<1x1x128xf32>,
      %132 = vector.shape_cast %129 : vector<1x128xf32> to vector<1x1x128xf32>
      %c0_61 = arith.constant 0 : index
      %c0_62 = arith.constant 0 : index
      %c0_63 = arith.constant 0 : index
      %133 = vector.load %arg5[%c0_61, %c0_62, %c0_63] : memref<1x1x128xf32, #tpu.memory_space<vmem>>, vector<1x1x128xf32>
      tpu.vector_store %arg5[%c0_61, %c0_62, %c0_63], %132 {strides = array<i32>} : memref<1x1x128xf32, #tpu.memory_space<vmem>>, vector<1x1x128xf32>,
    } else {
    }
    %c0_i32_4 = arith.constant 0 : i32
    %5 = arith.cmpi eq, %arg0, %c0_i32_4 : i32
    %6 = arith.extui %5 : i1 to i32
    %c0_i32_5 = arith.constant 0 : i32
    %7 = arith.cmpi ne, %6, %c0_i32_5 : i32
    scf.if %7 {
      %c24_i32 = arith.constant 24 : i32
      %8 = arith.muli %arg0, %c24_i32 : i32
      %9 = tpu.iota {dimensions = array<i32: 0>} : vector<24x1xi32>
      %10 = vector.broadcast %8 : i32 to vector<24x1xi32>
      %11 = arith.addi %10, %9 : vector<24x1xi32>
      %c20_i32 = arith.constant 20 : i32
      %12 = vector.broadcast %c20_i32 : i32 to vector<24x1xi32>
      %13 = arith.cmpi slt, %11, %12 : vector<24x1xi32>
      %14 = arith.extui %13 : vector<24x1xi1> to vector<24x1xi32>
      %15 = arith.sitofp %14 : vector<24x1xi32> to vector<24x1xf32>
      %cst = arith.constant 0.000000e+00 : f32
      %16 = vector.broadcast %cst : f32 to vector<1x128xf32>
      %cst_6 = arith.constant 0.000000e+00 : f32
      %17 = vector.broadcast %cst_6 : f32 to vector<1x128xf32>
      %c0_7 = arith.constant 0 : index
      %c0_8 = arith.constant 0 : index
      %c0_9 = arith.constant 0 : index
      %18 = vector.load %arg1[%c0_7, %c0_8, %c0_9] : memref<10x24x7xbf16, #tpu.memory_space<vmem>>, vector<1x24x7xbf16>
      %19 = vector.shape_cast %18 : vector<1x24x7xbf16> to vector<24x7xbf16>
      %cst_10 = arith.constant dense<0.000000e+00> : vector<24x128xf32>
      %20 = tpu.matmul %19, %0, %cst_10 {dimension_numbers = #tpu.dot_dimension_numbers<[1], [0], [0], [1], [0, 0, 1, 1], [], []>} : vector<24x7xbf16>, vector<7x128xbf16>, vector<24x128xf32> -> vector<24x128xf32>
      %21 = vector.broadcast %1 : vector<1x128xf32> to vector<24x128xf32>
      %22 = arith.addf %20, %21 : vector<24x128xf32>
      %23 = vector.broadcast %15 : vector<24x1xf32> to vector<24x128xf32>
      %24 = arith.mulf %22, %23 : vector<24x128xf32>
      %cst_11 = arith.constant dense<0.000000e+00> : vector<128xf32>
      %25 = vector.multi_reduction <add>, %24, %cst_11 [0] : vector<24x128xf32> to vector<128xf32>
      %26 = vector.shape_cast %25 : vector<128xf32> to vector<1x128xf32>
      %27 = arith.addf %16, %26 : vector<1x128xf32>
      %28 = arith.mulf %24, %24 : vector<24x128xf32>
      %cst_12 = arith.constant dense<0.000000e+00> : vector<128xf32>
      %29 = vector.multi_reduction <add>, %28, %cst_12 [0] : vector<24x128xf32> to vector<128xf32>
      %30 = vector.shape_cast %29 : vector<128xf32> to vector<1x128xf32>
      %31 = arith.addf %17, %30 : vector<1x128xf32>
      %c1 = arith.constant 1 : index
      %c0_13 = arith.constant 0 : index
      %c0_14 = arith.constant 0 : index
      %32 = vector.load %arg1[%c1, %c0_13, %c0_14] : memref<10x24x7xbf16, #tpu.memory_space<vmem>>, vector<1x24x7xbf16>
      %33 = vector.shape_cast %32 : vector<1x24x7xbf16> to vector<24x7xbf16>
      %cst_15 = arith.constant dense<0.000000e+00> : vector<24x128xf32>
      %34 = tpu.matmul %33, %0, %cst_15 {dimension_numbers = #tpu.dot_dimension_numbers<[1], [0], [0], [1], [0, 0, 1, 1], [], []>} : vector<24x7xbf16>, vector<7x128xbf16>, vector<24x128xf32> -> vector<24x128xf32>
      %35 = vector.broadcast %1 : vector<1x128xf32> to vector<24x128xf32>
      %36 = arith.addf %34, %35 : vector<24x128xf32>
      %37 = vector.broadcast %15 : vector<24x1xf32> to vector<24x128xf32>
      %38 = arith.mulf %36, %37 : vector<24x128xf32>
      %cst_16 = arith.constant dense<0.000000e+00> : vector<128xf32>
      %39 = vector.multi_reduction <add>, %38, %cst_16 [0] : vector<24x128xf32> to vector<128xf32>
      %40 = vector.shape_cast %39 : vector<128xf32> to vector<1x128xf32>
      %41 = arith.addf %27, %40 : vector<1x128xf32>
      %42 = arith.mulf %38, %38 : vector<24x128xf32>
      %cst_17 = arith.constant dense<0.000000e+00> : vector<128xf32>
      %43 = vector.multi_reduction <add>, %42, %cst_17 [0] : vector<24x128xf32> to vector<128xf32>
      %44 = vector.shape_cast %43 : vector<128xf32> to vector<1x128xf32>
      %45 = arith.addf %31, %44 : vector<1x128xf32>
      %c2 = arith.constant 2 : index
      %c0_18 = arith.constant 0 : index
      %c0_19 = arith.constant 0 : index
      %46 = vector.load %arg1[%c2, %c0_18, %c0_19] : memref<10x24x7xbf16, #tpu.memory_space<vmem>>, vector<1x24x7xbf16>
      %47 = vector.shape_cast %46 : vector<1x24x7xbf16> to vector<24x7xbf16>
      %cst_20 = arith.constant dense<0.000000e+00> : vector<24x128xf32>
      %48 = tpu.matmul %47, %0, %cst_20 {dimension_numbers = #tpu.dot_dimension_numbers<[1], [0], [0], [1], [0, 0, 1, 1], [], []>} : vector<24x7xbf16>, vector<7x128xbf16>, vector<24x128xf32> -> vector<24x128xf32>
      %49 = vector.broadcast %1 : vector<1x128xf32> to vector<24x128xf32>
      %50 = arith.addf %48, %49 : vector<24x128xf32>
      %51 = vector.broadcast %15 : vector<24x1xf32> to vector<24x128xf32>
      %52 = arith.mulf %50, %51 : vector<24x128xf32>
      %cst_21 = arith.constant dense<0.000000e+00> : vector<128xf32>
      %53 = vector.multi_reduction <add>, %52, %cst_21 [0] : vector<24x128xf32> to vector<128xf32>
      %54 = vector.shape_cast %53 : vector<128xf32> to vector<1x128xf32>
      %55 = arith.addf %41, %54 : vector<1x128xf32>
      %56 = arith.mulf %52, %52 : vector<24x128xf32>
      %cst_22 = arith.constant dense<0.000000e+00> : vector<128xf32>
      %57 = vector.multi_reduction <add>, %56, %cst_22 [0] : vector<24x128xf32> to vector<128xf32>
      %58 = vector.shape_cast %57 : vector<128xf32> to vector<1x128xf32>
      %59 = arith.addf %45, %58 : vector<1x128xf32>
      %c3 = arith.constant 3 : index
      %c0_23 = arith.constant 0 : index
      %c0_24 = arith.constant 0 : index
      %60 = vector.load %arg1[%c3, %c0_23, %c0_24] : memref<10x24x7xbf16, #tpu.memory_space<vmem>>, vector<1x24x7xbf16>
      %61 = vector.shape_cast %60 : vector<1x24x7xbf16> to vector<24x7xbf16>
      %cst_25 = arith.constant dense<0.000000e+00> : vector<24x128xf32>
      %62 = tpu.matmul %61, %0, %cst_25 {dimension_numbers = #tpu.dot_dimension_numbers<[1], [0], [0], [1], [0, 0, 1, 1], [], []>} : vector<24x7xbf16>, vector<7x128xbf16>, vector<24x128xf32> -> vector<24x128xf32>
      %63 = vector.broadcast %1 : vector<1x128xf32> to vector<24x128xf32>
      %64 = arith.addf %62, %63 : vector<24x128xf32>
      %65 = vector.broadcast %15 : vector<24x1xf32> to vector<24x128xf32>
      %66 = arith.mulf %64, %65 : vector<24x128xf32>
      %cst_26 = arith.constant dense<0.000000e+00> : vector<128xf32>
      %67 = vector.multi_reduction <add>, %66, %cst_26 [0] : vector<24x128xf32> to vector<128xf32>
      %68 = vector.shape_cast %67 : vector<128xf32> to vector<1x128xf32>
      %69 = arith.addf %55, %68 : vector<1x128xf32>
      %70 = arith.mulf %66, %66 : vector<24x128xf32>
      %cst_27 = arith.constant dense<0.000000e+00> : vector<128xf32>
      %71 = vector.multi_reduction <add>, %70, %cst_27 [0] : vector<24x128xf32> to vector<128xf32>
      %72 = vector.shape_cast %71 : vector<128xf32> to vector<1x128xf32>
      %73 = arith.addf %59, %72 : vector<1x128xf32>
      %c4 = arith.constant 4 : index
      %c0_28 = arith.constant 0 : index
      %c0_29 = arith.constant 0 : index
      %74 = vector.load %arg1[%c4, %c0_28, %c0_29] : memref<10x24x7xbf16, #tpu.memory_space<vmem>>, vector<1x24x7xbf16>
      %75 = vector.shape_cast %74 : vector<1x24x7xbf16> to vector<24x7xbf16>
      %cst_30 = arith.constant dense<0.000000e+00> : vector<24x128xf32>
      %76 = tpu.matmul %75, %0, %cst_30 {dimension_numbers = #tpu.dot_dimension_numbers<[1], [0], [0], [1], [0, 0, 1, 1], [], []>} : vector<24x7xbf16>, vector<7x128xbf16>, vector<24x128xf32> -> vector<24x128xf32>
      %77 = vector.broadcast %1 : vector<1x128xf32> to vector<24x128xf32>
      %78 = arith.addf %76, %77 : vector<24x128xf32>
      %79 = vector.broadcast %15 : vector<24x1xf32> to vector<24x128xf32>
      %80 = arith.mulf %78, %79 : vector<24x128xf32>
      %cst_31 = arith.constant dense<0.000000e+00> : vector<128xf32>
      %81 = vector.multi_reduction <add>, %80, %cst_31 [0] : vector<24x128xf32> to vector<128xf32>
      %82 = vector.shape_cast %81 : vector<128xf32> to vector<1x128xf32>
      %83 = arith.addf %69, %82 : vector<1x128xf32>
      %84 = arith.mulf %80, %80 : vector<24x128xf32>
      %cst_32 = arith.constant dense<0.000000e+00> : vector<128xf32>
      %85 = vector.multi_reduction <add>, %84, %cst_32 [0] : vector<24x128xf32> to vector<128xf32>
      %86 = vector.shape_cast %85 : vector<128xf32> to vector<1x128xf32>
      %87 = arith.addf %73, %86 : vector<1x128xf32>
      %c5 = arith.constant 5 : index
      %c0_33 = arith.constant 0 : index
      %c0_34 = arith.constant 0 : index
      %88 = vector.load %arg1[%c5, %c0_33, %c0_34] : memref<10x24x7xbf16, #tpu.memory_space<vmem>>, vector<1x24x7xbf16>
      %89 = vector.shape_cast %88 : vector<1x24x7xbf16> to vector<24x7xbf16>
      %cst_35 = arith.constant dense<0.000000e+00> : vector<24x128xf32>
      %90 = tpu.matmul %89, %0, %cst_35 {dimension_numbers = #tpu.dot_dimension_numbers<[1], [0], [0], [1], [0, 0, 1, 1], [], []>} : vector<24x7xbf16>, vector<7x128xbf16>, vector<24x128xf32> -> vector<24x128xf32>
      %91 = vector.broadcast %1 : vector<1x128xf32> to vector<24x128xf32>
      %92 = arith.addf %90, %91 : vector<24x128xf32>
      %93 = vector.broadcast %15 : vector<24x1xf32> to vector<24x128xf32>
      %94 = arith.mulf %92, %93 : vector<24x128xf32>
      %cst_36 = arith.constant dense<0.000000e+00> : vector<128xf32>
      %95 = vector.multi_reduction <add>, %94, %cst_36 [0] : vector<24x128xf32> to vector<128xf32>
      %96 = vector.shape_cast %95 : vector<128xf32> to vector<1x128xf32>
      %97 = arith.addf %83, %96 : vector<1x128xf32>
      %98 = arith.mulf %94, %94 : vector<24x128xf32>
      %cst_37 = arith.constant dense<0.000000e+00> : vector<128xf32>
      %99 = vector.multi_reduction <add>, %98, %cst_37 [0] : vector<24x128xf32> to vector<128xf32>
      %100 = vector.shape_cast %99 : vector<128xf32> to vector<1x128xf32>
      %101 = arith.addf %87, %100 : vector<1x128xf32>
      %c6 = arith.constant 6 : index
      %c0_38 = arith.constant 0 : index
      %c0_39 = arith.constant 0 : index
      %102 = vector.load %arg1[%c6, %c0_38, %c0_39] : memref<10x24x7xbf16, #tpu.memory_space<vmem>>, vector<1x24x7xbf16>
      %103 = vector.shape_cast %102 : vector<1x24x7xbf16> to vector<24x7xbf16>
      %cst_40 = arith.constant dense<0.000000e+00> : vector<24x128xf32>
      %104 = tpu.matmul %103, %0, %cst_40 {dimension_numbers = #tpu.dot_dimension_numbers<[1], [0], [0], [1], [0, 0, 1, 1], [], []>} : vector<24x7xbf16>, vector<7x128xbf16>, vector<24x128xf32> -> vector<24x128xf32>
      %105 = vector.broadcast %1 : vector<1x128xf32> to vector<24x128xf32>
      %106 = arith.addf %104, %105 : vector<24x128xf32>
      %107 = vector.broadcast %15 : vector<24x1xf32> to vector<24x128xf32>
      %108 = arith.mulf %106, %107 : vector<24x128xf32>
      %cst_41 = arith.constant dense<0.000000e+00> : vector<128xf32>
      %109 = vector.multi_reduction <add>, %108, %cst_41 [0] : vector<24x128xf32> to vector<128xf32>
      %110 = vector.shape_cast %109 : vector<128xf32> to vector<1x128xf32>
      %111 = arith.addf %97, %110 : vector<1x128xf32>
      %112 = arith.mulf %108, %108 : vector<24x128xf32>
      %cst_42 = arith.constant dense<0.000000e+00> : vector<128xf32>
      %113 = vector.multi_reduction <add>, %112, %cst_42 [0] : vector<24x128xf32> to vector<128xf32>
      %114 = vector.shape_cast %113 : vector<128xf32> to vector<1x128xf32>
      %115 = arith.addf %101, %114 : vector<1x128xf32>
      %c7 = arith.constant 7 : index
      %c0_43 = arith.constant 0 : index
      %c0_44 = arith.constant 0 : index
      %116 = vector.load %arg1[%c7, %c0_43, %c0_44] : memref<10x24x7xbf16, #tpu.memory_space<vmem>>, vector<1x24x7xbf16>
      %117 = vector.shape_cast %116 : vector<1x24x7xbf16> to vector<24x7xbf16>
      %cst_45 = arith.constant dense<0.000000e+00> : vector<24x128xf32>
      %118 = tpu.matmul %117, %0, %cst_45 {dimension_numbers = #tpu.dot_dimension_numbers<[1], [0], [0], [1], [0, 0, 1, 1], [], []>} : vector<24x7xbf16>, vector<7x128xbf16>, vector<24x128xf32> -> vector<24x128xf32>
      %119 = vector.broadcast %1 : vector<1x128xf32> to vector<24x128xf32>
      %120 = arith.addf %118, %119 : vector<24x128xf32>
      %121 = vector.broadcast %15 : vector<24x1xf32> to vector<24x128xf32>
      %122 = arith.mulf %120, %121 : vector<24x128xf32>
      %cst_46 = arith.constant dense<0.000000e+00> : vector<128xf32>
      %123 = vector.multi_reduction <add>, %122, %cst_46 [0] : vector<24x128xf32> to vector<128xf32>
      %124 = vector.shape_cast %123 : vector<128xf32> to vector<1x128xf32>
      %125 = arith.addf %111, %124 : vector<1x128xf32>
      %126 = arith.mulf %122, %122 : vector<24x128xf32>
      %cst_47 = arith.constant dense<0.000000e+00> : vector<128xf32>
      %127 = vector.multi_reduction <add>, %126, %cst_47 [0] : vector<24x128xf32> to vector<128xf32>
      %128 = vector.shape_cast %127 : vector<128xf32> to vector<1x128xf32>
      %129 = arith.addf %115, %128 : vector<1x128xf32>
      %c8 = arith.constant 8 : index
      %c0_48 = arith.constant 0 : index
      %c0_49 = arith.constant 0 : index
      %130 = vector.load %arg1[%c8, %c0_48, %c0_49] : memref<10x24x7xbf16, #tpu.memory_space<vmem>>, vector<1x24x7xbf16>
      %131 = vector.shape_cast %130 : vector<1x24x7xbf16> to vector<24x7xbf16>
      %cst_50 = arith.constant dense<0.000000e+00> : vector<24x128xf32>
      %132 = tpu.matmul %131, %0, %cst_50 {dimension_numbers = #tpu.dot_dimension_numbers<[1], [0], [0], [1], [0, 0, 1, 1], [], []>} : vector<24x7xbf16>, vector<7x128xbf16>, vector<24x128xf32> -> vector<24x128xf32>
      %133 = vector.broadcast %1 : vector<1x128xf32> to vector<24x128xf32>
      %134 = arith.addf %132, %133 : vector<24x128xf32>
      %135 = vector.broadcast %15 : vector<24x1xf32> to vector<24x128xf32>
      %136 = arith.mulf %134, %135 : vector<24x128xf32>
      %cst_51 = arith.constant dense<0.000000e+00> : vector<128xf32>
      %137 = vector.multi_reduction <add>, %136, %cst_51 [0] : vector<24x128xf32> to vector<128xf32>
      %138 = vector.shape_cast %137 : vector<128xf32> to vector<1x128xf32>
      %139 = arith.addf %125, %138 : vector<1x128xf32>
      %140 = arith.mulf %136, %136 : vector<24x128xf32>
      %cst_52 = arith.constant dense<0.000000e+00> : vector<128xf32>
      %141 = vector.multi_reduction <add>, %140, %cst_52 [0] : vector<24x128xf32> to vector<128xf32>
      %142 = vector.shape_cast %141 : vector<128xf32> to vector<1x128xf32>
      %143 = arith.addf %129, %142 : vector<1x128xf32>
      %c9 = arith.constant 9 : index
      %c0_53 = arith.constant 0 : index
      %c0_54 = arith.constant 0 : index
      %144 = vector.load %arg1[%c9, %c0_53, %c0_54] : memref<10x24x7xbf16, #tpu.memory_space<vmem>>, vector<1x24x7xbf16>
      %145 = vector.shape_cast %144 : vector<1x24x7xbf16> to vector<24x7xbf16>
      %cst_55 = arith.constant dense<0.000000e+00> : vector<24x128xf32>
      %146 = tpu.matmul %145, %0, %cst_55 {dimension_numbers = #tpu.dot_dimension_numbers<[1], [0], [0], [1], [0, 0, 1, 1], [], []>} : vector<24x7xbf16>, vector<7x128xbf16>, vector<24x128xf32> -> vector<24x128xf32>
      %147 = vector.broadcast %1 : vector<1x128xf32> to vector<24x128xf32>
      %148 = arith.addf %146, %147 : vector<24x128xf32>
      %149 = vector.broadcast %15 : vector<24x1xf32> to vector<24x128xf32>
      %150 = arith.mulf %148, %149 : vector<24x128xf32>
      %cst_56 = arith.constant dense<0.000000e+00> : vector<128xf32>
      %151 = vector.multi_reduction <add>, %150, %cst_56 [0] : vector<24x128xf32> to vector<128xf32>
      %152 = vector.shape_cast %151 : vector<128xf32> to vector<1x128xf32>
      %153 = arith.addf %139, %152 : vector<1x128xf32>
      %154 = arith.mulf %150, %150 : vector<24x128xf32>
      %cst_57 = arith.constant dense<0.000000e+00> : vector<128xf32>
      %155 = vector.multi_reduction <add>, %154, %cst_57 [0] : vector<24x128xf32> to vector<128xf32>
      %156 = vector.shape_cast %155 : vector<128xf32> to vector<1x128xf32>
      %157 = arith.addf %143, %156 : vector<1x128xf32>
      %158 = vector.shape_cast %153 : vector<1x128xf32> to vector<1x1x128xf32>
      %c0_58 = arith.constant 0 : index
      %c0_59 = arith.constant 0 : index
      %c0_60 = arith.constant 0 : index
      %159 = vector.load %arg4[%c0_58, %c0_59, %c0_60] : memref<1x1x128xf32, #tpu.memory_space<vmem>>, vector<1x1x128xf32>
      tpu.vector_store %arg4[%c0_58, %c0_59, %c0_60], %158 {strides = array<i32>} : memref<1x1x128xf32, #tpu.memory_space<vmem>>, vector<1x1x128xf32>,
      %160 = vector.shape_cast %157 : vector<1x128xf32> to vector<1x1x128xf32>
      %c0_61 = arith.constant 0 : index
      %c0_62 = arith.constant 0 : index
      %c0_63 = arith.constant 0 : index
      %161 = vector.load %arg5[%c0_61, %c0_62, %c0_63] : memref<1x1x128xf32, #tpu.memory_space<vmem>>, vector<1x1x128xf32>
      tpu.vector_store %arg5[%c0_61, %c0_62, %c0_63], %160 {strides = array<i32>} : memref<1x1x128xf32, #tpu.memory_space<vmem>>, vector<1x1x128xf32>,
    } else {
    }
    return
  }
  func.func @transform_0(%arg0: i32) -> (i32, i32, i32) {
    %c0_i32 = arith.constant 0 : i32
    %c0_i32_0 = arith.constant 0 : i32
    %c0_i32_1 = arith.constant 0 : i32
    return %c0_i32, %arg0, %c0_i32_0 : i32, i32, i32
  }
  func.func @transform_1(%arg0: i32) -> (i32, i32) {
    %c0_i32 = arith.constant 0 : i32
    %c0_i32_0 = arith.constant 0 : i32
    %c0_i32_1 = arith.constant 0 : i32
    return %c0_i32, %c0_i32_0 : i32, i32
  }
  func.func @transform_2(%arg0: i32) -> (i32, i32) {
    %c0_i32 = arith.constant 0 : i32
    %c0_i32_0 = arith.constant 0 : i32
    %c0_i32_1 = arith.constant 0 : i32
    return %c0_i32, %c0_i32_0 : i32, i32
  }
  func.func @transform_3(%arg0: i32) -> (i32, i32, i32) {
    %c0_i32 = arith.constant 0 : i32
    %c0_i32_0 = arith.constant 0 : i32
    %c0_i32_1 = arith.constant 0 : i32
    return %arg0, %c0_i32, %c0_i32_0 : i32, i32, i32
  }
  func.func @transform_4(%arg0: i32) -> (i32, i32, i32) {
    %c0_i32 = arith.constant 0 : i32
    %c0_i32_0 = arith.constant 0 : i32
    %c0_i32_1 = arith.constant 0 : i32
    return %arg0, %c0_i32, %c0_i32_0 : i32, i32, i32
  }
}

module attributes {stable_mosaic.version = 11 : i64} {
  func.func @_apply_kernel(%arg0: i32, %arg1: memref<10x24x7xbf16, #tpu.memory_space<vmem>>, %arg2: memref<7x128xbf16, #tpu.memory_space<vmem>>, %arg3: memref<1x128xf32, #tpu.memory_space<vmem>>, %arg4: memref<1x128xf32, #tpu.memory_space<vmem>>, %arg5: memref<10x24x1xf32, #tpu.memory_space<vmem>>, %arg6: memref<10x24x128xf32, #tpu.memory_space<vmem>>) attributes {dimension_semantics = [#tpu.dimension_semantics<parallel>], iteration_bounds = array<i64: 1>, scalar_prefetch = 0 : i64, scratch_operands = 0 : i64, tpu.core_type = #tpu.core_type<tc>, window_params = [{transform_indices = @transform_0, window_bounds = array<i64: 10, 24, 7>}, {pipeline_mode = #tpu.pipeline_mode<synchronous>, transform_indices = @transform_1, window_bounds = array<i64: 7, 128>}, {pipeline_mode = #tpu.pipeline_mode<synchronous>, transform_indices = @transform_2, window_bounds = array<i64: 1, 128>}, {pipeline_mode = #tpu.pipeline_mode<synchronous>, transform_indices = @transform_3, window_bounds = array<i64: 1, 128>}, {transform_indices = @transform_4, window_bounds = array<i64: 10, 24, 1>}, {transform_indices = @transform_5, window_bounds = array<i64: 10, 24, 128>}]} {
    %c0 = arith.constant 0 : index
    %c0_0 = arith.constant 0 : index
    %0 = vector.load %arg2[%c0, %c0_0] : memref<7x128xbf16, #tpu.memory_space<vmem>>, vector<7x128xbf16>
    %c0_1 = arith.constant 0 : index
    %c0_2 = arith.constant 0 : index
    %1 = vector.load %arg3[%c0_1, %c0_2] : memref<1x128xf32, #tpu.memory_space<vmem>>, vector<1x128xf32>
    %c0_3 = arith.constant 0 : index
    %c0_4 = arith.constant 0 : index
    %2 = vector.load %arg4[%c0_3, %c0_4] : memref<1x128xf32, #tpu.memory_space<vmem>>, vector<1x128xf32>
    %c0_5 = arith.constant 0 : index
    %c0_6 = arith.constant 0 : index
    %c0_7 = arith.constant 0 : index
    %3 = vector.load %arg1[%c0_5, %c0_6, %c0_7] : memref<10x24x7xbf16, #tpu.memory_space<vmem>>, vector<1x24x7xbf16>
    %4 = vector.shape_cast %3 : vector<1x24x7xbf16> to vector<24x7xbf16>
    %cst = arith.constant dense<0.000000e+00> : vector<24x128xf32>
    %5 = tpu.matmul %4, %0, %cst {dimension_numbers = #tpu.dot_dimension_numbers<[1], [0], [0], [1], [0, 0, 1, 1], [], []>} : vector<24x7xbf16>, vector<7x128xbf16>, vector<24x128xf32> -> vector<24x128xf32>
    %6 = vector.broadcast %1 : vector<1x128xf32> to vector<24x128xf32>
    %7 = arith.mulf %5, %6 : vector<24x128xf32>
    %8 = vector.broadcast %2 : vector<1x128xf32> to vector<24x128xf32>
    %9 = arith.addf %7, %8 : vector<24x128xf32>
    %cst_8 = arith.constant 0.000000e+00 : f32
    %10 = vector.broadcast %cst_8 : f32 to vector<24x128xf32>
    %11 = arith.maximumf %9, %10 : vector<24x128xf32>
    %c0_9 = arith.constant 0 : index
    %c0_10 = arith.constant 0 : index
    %c0_11 = arith.constant 0 : index
    %12 = vector.load %arg6[%c0_9, %c0_10, %c0_11] : memref<10x24x128xf32, #tpu.memory_space<vmem>>, vector<1x24x128xf32>
    %13 = vector.shape_cast %12 : vector<1x24x128xf32> to vector<24x128xf32>
    %14 = vector.shape_cast %11 : vector<24x128xf32> to vector<1x24x128xf32>
    tpu.vector_store %arg6[%c0_9, %c0_10, %c0_11], %14 {strides = array<i32>} : memref<10x24x128xf32, #tpu.memory_space<vmem>>, vector<1x24x128xf32>,
    %c1 = arith.constant 1 : index
    %c0_12 = arith.constant 0 : index
    %c0_13 = arith.constant 0 : index
    %15 = vector.load %arg1[%c1, %c0_12, %c0_13] : memref<10x24x7xbf16, #tpu.memory_space<vmem>>, vector<1x24x7xbf16>
    %16 = vector.shape_cast %15 : vector<1x24x7xbf16> to vector<24x7xbf16>
    %cst_14 = arith.constant dense<0.000000e+00> : vector<24x128xf32>
    %17 = tpu.matmul %16, %0, %cst_14 {dimension_numbers = #tpu.dot_dimension_numbers<[1], [0], [0], [1], [0, 0, 1, 1], [], []>} : vector<24x7xbf16>, vector<7x128xbf16>, vector<24x128xf32> -> vector<24x128xf32>
    %18 = vector.broadcast %1 : vector<1x128xf32> to vector<24x128xf32>
    %19 = arith.mulf %17, %18 : vector<24x128xf32>
    %20 = vector.broadcast %2 : vector<1x128xf32> to vector<24x128xf32>
    %21 = arith.addf %19, %20 : vector<24x128xf32>
    %cst_15 = arith.constant 0.000000e+00 : f32
    %22 = vector.broadcast %cst_15 : f32 to vector<24x128xf32>
    %23 = arith.maximumf %21, %22 : vector<24x128xf32>
    %c1_16 = arith.constant 1 : index
    %c0_17 = arith.constant 0 : index
    %c0_18 = arith.constant 0 : index
    %24 = vector.load %arg6[%c1_16, %c0_17, %c0_18] : memref<10x24x128xf32, #tpu.memory_space<vmem>>, vector<1x24x128xf32>
    %25 = vector.shape_cast %24 : vector<1x24x128xf32> to vector<24x128xf32>
    %26 = vector.shape_cast %23 : vector<24x128xf32> to vector<1x24x128xf32>
    tpu.vector_store %arg6[%c1_16, %c0_17, %c0_18], %26 {strides = array<i32>} : memref<10x24x128xf32, #tpu.memory_space<vmem>>, vector<1x24x128xf32>,
    %27 = arith.maximumf %11, %23 : vector<24x128xf32>
    %c2 = arith.constant 2 : index
    %c0_19 = arith.constant 0 : index
    %c0_20 = arith.constant 0 : index
    %28 = vector.load %arg1[%c2, %c0_19, %c0_20] : memref<10x24x7xbf16, #tpu.memory_space<vmem>>, vector<1x24x7xbf16>
    %29 = vector.shape_cast %28 : vector<1x24x7xbf16> to vector<24x7xbf16>
    %cst_21 = arith.constant dense<0.000000e+00> : vector<24x128xf32>
    %30 = tpu.matmul %29, %0, %cst_21 {dimension_numbers = #tpu.dot_dimension_numbers<[1], [0], [0], [1], [0, 0, 1, 1], [], []>} : vector<24x7xbf16>, vector<7x128xbf16>, vector<24x128xf32> -> vector<24x128xf32>
    %31 = vector.broadcast %1 : vector<1x128xf32> to vector<24x128xf32>
    %32 = arith.mulf %30, %31 : vector<24x128xf32>
    %33 = vector.broadcast %2 : vector<1x128xf32> to vector<24x128xf32>
    %34 = arith.addf %32, %33 : vector<24x128xf32>
    %cst_22 = arith.constant 0.000000e+00 : f32
    %35 = vector.broadcast %cst_22 : f32 to vector<24x128xf32>
    %36 = arith.maximumf %34, %35 : vector<24x128xf32>
    %c2_23 = arith.constant 2 : index
    %c0_24 = arith.constant 0 : index
    %c0_25 = arith.constant 0 : index
    %37 = vector.load %arg6[%c2_23, %c0_24, %c0_25] : memref<10x24x128xf32, #tpu.memory_space<vmem>>, vector<1x24x128xf32>
    %38 = vector.shape_cast %37 : vector<1x24x128xf32> to vector<24x128xf32>
    %39 = vector.shape_cast %36 : vector<24x128xf32> to vector<1x24x128xf32>
    tpu.vector_store %arg6[%c2_23, %c0_24, %c0_25], %39 {strides = array<i32>} : memref<10x24x128xf32, #tpu.memory_space<vmem>>, vector<1x24x128xf32>,
    %40 = arith.maximumf %27, %36 : vector<24x128xf32>
    %c3 = arith.constant 3 : index
    %c0_26 = arith.constant 0 : index
    %c0_27 = arith.constant 0 : index
    %41 = vector.load %arg1[%c3, %c0_26, %c0_27] : memref<10x24x7xbf16, #tpu.memory_space<vmem>>, vector<1x24x7xbf16>
    %42 = vector.shape_cast %41 : vector<1x24x7xbf16> to vector<24x7xbf16>
    %cst_28 = arith.constant dense<0.000000e+00> : vector<24x128xf32>
    %43 = tpu.matmul %42, %0, %cst_28 {dimension_numbers = #tpu.dot_dimension_numbers<[1], [0], [0], [1], [0, 0, 1, 1], [], []>} : vector<24x7xbf16>, vector<7x128xbf16>, vector<24x128xf32> -> vector<24x128xf32>
    %44 = vector.broadcast %1 : vector<1x128xf32> to vector<24x128xf32>
    %45 = arith.mulf %43, %44 : vector<24x128xf32>
    %46 = vector.broadcast %2 : vector<1x128xf32> to vector<24x128xf32>
    %47 = arith.addf %45, %46 : vector<24x128xf32>
    %cst_29 = arith.constant 0.000000e+00 : f32
    %48 = vector.broadcast %cst_29 : f32 to vector<24x128xf32>
    %49 = arith.maximumf %47, %48 : vector<24x128xf32>
    %c3_30 = arith.constant 3 : index
    %c0_31 = arith.constant 0 : index
    %c0_32 = arith.constant 0 : index
    %50 = vector.load %arg6[%c3_30, %c0_31, %c0_32] : memref<10x24x128xf32, #tpu.memory_space<vmem>>, vector<1x24x128xf32>
    %51 = vector.shape_cast %50 : vector<1x24x128xf32> to vector<24x128xf32>
    %52 = vector.shape_cast %49 : vector<24x128xf32> to vector<1x24x128xf32>
    tpu.vector_store %arg6[%c3_30, %c0_31, %c0_32], %52 {strides = array<i32>} : memref<10x24x128xf32, #tpu.memory_space<vmem>>, vector<1x24x128xf32>,
    %53 = arith.maximumf %40, %49 : vector<24x128xf32>
    %c4 = arith.constant 4 : index
    %c0_33 = arith.constant 0 : index
    %c0_34 = arith.constant 0 : index
    %54 = vector.load %arg1[%c4, %c0_33, %c0_34] : memref<10x24x7xbf16, #tpu.memory_space<vmem>>, vector<1x24x7xbf16>
    %55 = vector.shape_cast %54 : vector<1x24x7xbf16> to vector<24x7xbf16>
    %cst_35 = arith.constant dense<0.000000e+00> : vector<24x128xf32>
    %56 = tpu.matmul %55, %0, %cst_35 {dimension_numbers = #tpu.dot_dimension_numbers<[1], [0], [0], [1], [0, 0, 1, 1], [], []>} : vector<24x7xbf16>, vector<7x128xbf16>, vector<24x128xf32> -> vector<24x128xf32>
    %57 = vector.broadcast %1 : vector<1x128xf32> to vector<24x128xf32>
    %58 = arith.mulf %56, %57 : vector<24x128xf32>
    %59 = vector.broadcast %2 : vector<1x128xf32> to vector<24x128xf32>
    %60 = arith.addf %58, %59 : vector<24x128xf32>
    %cst_36 = arith.constant 0.000000e+00 : f32
    %61 = vector.broadcast %cst_36 : f32 to vector<24x128xf32>
    %62 = arith.maximumf %60, %61 : vector<24x128xf32>
    %c4_37 = arith.constant 4 : index
    %c0_38 = arith.constant 0 : index
    %c0_39 = arith.constant 0 : index
    %63 = vector.load %arg6[%c4_37, %c0_38, %c0_39] : memref<10x24x128xf32, #tpu.memory_space<vmem>>, vector<1x24x128xf32>
    %64 = vector.shape_cast %63 : vector<1x24x128xf32> to vector<24x128xf32>
    %65 = vector.shape_cast %62 : vector<24x128xf32> to vector<1x24x128xf32>
    tpu.vector_store %arg6[%c4_37, %c0_38, %c0_39], %65 {strides = array<i32>} : memref<10x24x128xf32, #tpu.memory_space<vmem>>, vector<1x24x128xf32>,
    %66 = arith.maximumf %53, %62 : vector<24x128xf32>
    %c5 = arith.constant 5 : index
    %c0_40 = arith.constant 0 : index
    %c0_41 = arith.constant 0 : index
    %67 = vector.load %arg1[%c5, %c0_40, %c0_41] : memref<10x24x7xbf16, #tpu.memory_space<vmem>>, vector<1x24x7xbf16>
    %68 = vector.shape_cast %67 : vector<1x24x7xbf16> to vector<24x7xbf16>
    %cst_42 = arith.constant dense<0.000000e+00> : vector<24x128xf32>
    %69 = tpu.matmul %68, %0, %cst_42 {dimension_numbers = #tpu.dot_dimension_numbers<[1], [0], [0], [1], [0, 0, 1, 1], [], []>} : vector<24x7xbf16>, vector<7x128xbf16>, vector<24x128xf32> -> vector<24x128xf32>
    %70 = vector.broadcast %1 : vector<1x128xf32> to vector<24x128xf32>
    %71 = arith.mulf %69, %70 : vector<24x128xf32>
    %72 = vector.broadcast %2 : vector<1x128xf32> to vector<24x128xf32>
    %73 = arith.addf %71, %72 : vector<24x128xf32>
    %cst_43 = arith.constant 0.000000e+00 : f32
    %74 = vector.broadcast %cst_43 : f32 to vector<24x128xf32>
    %75 = arith.maximumf %73, %74 : vector<24x128xf32>
    %c5_44 = arith.constant 5 : index
    %c0_45 = arith.constant 0 : index
    %c0_46 = arith.constant 0 : index
    %76 = vector.load %arg6[%c5_44, %c0_45, %c0_46] : memref<10x24x128xf32, #tpu.memory_space<vmem>>, vector<1x24x128xf32>
    %77 = vector.shape_cast %76 : vector<1x24x128xf32> to vector<24x128xf32>
    %78 = vector.shape_cast %75 : vector<24x128xf32> to vector<1x24x128xf32>
    tpu.vector_store %arg6[%c5_44, %c0_45, %c0_46], %78 {strides = array<i32>} : memref<10x24x128xf32, #tpu.memory_space<vmem>>, vector<1x24x128xf32>,
    %79 = arith.maximumf %66, %75 : vector<24x128xf32>
    %c6 = arith.constant 6 : index
    %c0_47 = arith.constant 0 : index
    %c0_48 = arith.constant 0 : index
    %80 = vector.load %arg1[%c6, %c0_47, %c0_48] : memref<10x24x7xbf16, #tpu.memory_space<vmem>>, vector<1x24x7xbf16>
    %81 = vector.shape_cast %80 : vector<1x24x7xbf16> to vector<24x7xbf16>
    %cst_49 = arith.constant dense<0.000000e+00> : vector<24x128xf32>
    %82 = tpu.matmul %81, %0, %cst_49 {dimension_numbers = #tpu.dot_dimension_numbers<[1], [0], [0], [1], [0, 0, 1, 1], [], []>} : vector<24x7xbf16>, vector<7x128xbf16>, vector<24x128xf32> -> vector<24x128xf32>
    %83 = vector.broadcast %1 : vector<1x128xf32> to vector<24x128xf32>
    %84 = arith.mulf %82, %83 : vector<24x128xf32>
    %85 = vector.broadcast %2 : vector<1x128xf32> to vector<24x128xf32>
    %86 = arith.addf %84, %85 : vector<24x128xf32>
    %cst_50 = arith.constant 0.000000e+00 : f32
    %87 = vector.broadcast %cst_50 : f32 to vector<24x128xf32>
    %88 = arith.maximumf %86, %87 : vector<24x128xf32>
    %c6_51 = arith.constant 6 : index
    %c0_52 = arith.constant 0 : index
    %c0_53 = arith.constant 0 : index
    %89 = vector.load %arg6[%c6_51, %c0_52, %c0_53] : memref<10x24x128xf32, #tpu.memory_space<vmem>>, vector<1x24x128xf32>
    %90 = vector.shape_cast %89 : vector<1x24x128xf32> to vector<24x128xf32>
    %91 = vector.shape_cast %88 : vector<24x128xf32> to vector<1x24x128xf32>
    tpu.vector_store %arg6[%c6_51, %c0_52, %c0_53], %91 {strides = array<i32>} : memref<10x24x128xf32, #tpu.memory_space<vmem>>, vector<1x24x128xf32>,
    %92 = arith.maximumf %79, %88 : vector<24x128xf32>
    %c7 = arith.constant 7 : index
    %c0_54 = arith.constant 0 : index
    %c0_55 = arith.constant 0 : index
    %93 = vector.load %arg1[%c7, %c0_54, %c0_55] : memref<10x24x7xbf16, #tpu.memory_space<vmem>>, vector<1x24x7xbf16>
    %94 = vector.shape_cast %93 : vector<1x24x7xbf16> to vector<24x7xbf16>
    %cst_56 = arith.constant dense<0.000000e+00> : vector<24x128xf32>
    %95 = tpu.matmul %94, %0, %cst_56 {dimension_numbers = #tpu.dot_dimension_numbers<[1], [0], [0], [1], [0, 0, 1, 1], [], []>} : vector<24x7xbf16>, vector<7x128xbf16>, vector<24x128xf32> -> vector<24x128xf32>
    %96 = vector.broadcast %1 : vector<1x128xf32> to vector<24x128xf32>
    %97 = arith.mulf %95, %96 : vector<24x128xf32>
    %98 = vector.broadcast %2 : vector<1x128xf32> to vector<24x128xf32>
    %99 = arith.addf %97, %98 : vector<24x128xf32>
    %cst_57 = arith.constant 0.000000e+00 : f32
    %100 = vector.broadcast %cst_57 : f32 to vector<24x128xf32>
    %101 = arith.maximumf %99, %100 : vector<24x128xf32>
    %c7_58 = arith.constant 7 : index
    %c0_59 = arith.constant 0 : index
    %c0_60 = arith.constant 0 : index
    %102 = vector.load %arg6[%c7_58, %c0_59, %c0_60] : memref<10x24x128xf32, #tpu.memory_space<vmem>>, vector<1x24x128xf32>
    %103 = vector.shape_cast %102 : vector<1x24x128xf32> to vector<24x128xf32>
    %104 = vector.shape_cast %101 : vector<24x128xf32> to vector<1x24x128xf32>
    tpu.vector_store %arg6[%c7_58, %c0_59, %c0_60], %104 {strides = array<i32>} : memref<10x24x128xf32, #tpu.memory_space<vmem>>, vector<1x24x128xf32>,
    %105 = arith.maximumf %92, %101 : vector<24x128xf32>
    %c8 = arith.constant 8 : index
    %c0_61 = arith.constant 0 : index
    %c0_62 = arith.constant 0 : index
    %106 = vector.load %arg1[%c8, %c0_61, %c0_62] : memref<10x24x7xbf16, #tpu.memory_space<vmem>>, vector<1x24x7xbf16>
    %107 = vector.shape_cast %106 : vector<1x24x7xbf16> to vector<24x7xbf16>
    %cst_63 = arith.constant dense<0.000000e+00> : vector<24x128xf32>
    %108 = tpu.matmul %107, %0, %cst_63 {dimension_numbers = #tpu.dot_dimension_numbers<[1], [0], [0], [1], [0, 0, 1, 1], [], []>} : vector<24x7xbf16>, vector<7x128xbf16>, vector<24x128xf32> -> vector<24x128xf32>
    %109 = vector.broadcast %1 : vector<1x128xf32> to vector<24x128xf32>
    %110 = arith.mulf %108, %109 : vector<24x128xf32>
    %111 = vector.broadcast %2 : vector<1x128xf32> to vector<24x128xf32>
    %112 = arith.addf %110, %111 : vector<24x128xf32>
    %cst_64 = arith.constant 0.000000e+00 : f32
    %113 = vector.broadcast %cst_64 : f32 to vector<24x128xf32>
    %114 = arith.maximumf %112, %113 : vector<24x128xf32>
    %c8_65 = arith.constant 8 : index
    %c0_66 = arith.constant 0 : index
    %c0_67 = arith.constant 0 : index
    %115 = vector.load %arg6[%c8_65, %c0_66, %c0_67] : memref<10x24x128xf32, #tpu.memory_space<vmem>>, vector<1x24x128xf32>
    %116 = vector.shape_cast %115 : vector<1x24x128xf32> to vector<24x128xf32>
    %117 = vector.shape_cast %114 : vector<24x128xf32> to vector<1x24x128xf32>
    tpu.vector_store %arg6[%c8_65, %c0_66, %c0_67], %117 {strides = array<i32>} : memref<10x24x128xf32, #tpu.memory_space<vmem>>, vector<1x24x128xf32>,
    %118 = arith.maximumf %105, %114 : vector<24x128xf32>
    %c9 = arith.constant 9 : index
    %c0_68 = arith.constant 0 : index
    %c0_69 = arith.constant 0 : index
    %119 = vector.load %arg1[%c9, %c0_68, %c0_69] : memref<10x24x7xbf16, #tpu.memory_space<vmem>>, vector<1x24x7xbf16>
    %120 = vector.shape_cast %119 : vector<1x24x7xbf16> to vector<24x7xbf16>
    %cst_70 = arith.constant dense<0.000000e+00> : vector<24x128xf32>
    %121 = tpu.matmul %120, %0, %cst_70 {dimension_numbers = #tpu.dot_dimension_numbers<[1], [0], [0], [1], [0, 0, 1, 1], [], []>} : vector<24x7xbf16>, vector<7x128xbf16>, vector<24x128xf32> -> vector<24x128xf32>
    %122 = vector.broadcast %1 : vector<1x128xf32> to vector<24x128xf32>
    %123 = arith.mulf %121, %122 : vector<24x128xf32>
    %124 = vector.broadcast %2 : vector<1x128xf32> to vector<24x128xf32>
    %125 = arith.addf %123, %124 : vector<24x128xf32>
    %cst_71 = arith.constant 0.000000e+00 : f32
    %126 = vector.broadcast %cst_71 : f32 to vector<24x128xf32>
    %127 = arith.maximumf %125, %126 : vector<24x128xf32>
    %c9_72 = arith.constant 9 : index
    %c0_73 = arith.constant 0 : index
    %c0_74 = arith.constant 0 : index
    %128 = vector.load %arg6[%c9_72, %c0_73, %c0_74] : memref<10x24x128xf32, #tpu.memory_space<vmem>>, vector<1x24x128xf32>
    %129 = vector.shape_cast %128 : vector<1x24x128xf32> to vector<24x128xf32>
    %130 = vector.shape_cast %127 : vector<24x128xf32> to vector<1x24x128xf32>
    tpu.vector_store %arg6[%c9_72, %c0_73, %c0_74], %130 {strides = array<i32>} : memref<10x24x128xf32, #tpu.memory_space<vmem>>, vector<1x24x128xf32>,
    %131 = arith.maximumf %118, %127 : vector<24x128xf32>
    %132 = tpu.iota {dimensions = array<i32: 1>} : vector<24x128xi32>
    %c16_i32 = arith.constant 16 : i32
    %133 = vector.broadcast %c16_i32 : i32 to vector<24x128xi32>
    %134 = arith.cmpi slt, %132, %133 : vector<24x128xi32>
    %c0_75 = arith.constant 0 : index
    %c0_76 = arith.constant 0 : index
    %c0_77 = arith.constant 0 : index
    %135 = vector.load %arg6[%c0_75, %c0_76, %c0_77] : memref<10x24x128xf32, #tpu.memory_space<vmem>>, vector<1x24x128xf32>
    %136 = vector.shape_cast %135 : vector<1x24x128xf32> to vector<24x128xf32>
    %137 = arith.select %134, %136, %131 : vector<24x128xi1>, vector<24x128xf32>
    %c0_78 = arith.constant 0 : index
    %c0_79 = arith.constant 0 : index
    %c0_80 = arith.constant 0 : index
    %138 = vector.load %arg5[%c0_78, %c0_79, %c0_80] : memref<10x24x1xf32, #tpu.memory_space<vmem>>, vector<1x24x1xf32>
    %139 = vector.shape_cast %138 : vector<1x24x1xf32> to vector<24x1xf32>
    %140 = vector.broadcast %139 : vector<24x1xf32> to vector<24x128xf32>
    %141 = arith.mulf %137, %140 : vector<24x128xf32>
    %c0_81 = arith.constant 0 : index
    %c0_82 = arith.constant 0 : index
    %c0_83 = arith.constant 0 : index
    %142 = vector.load %arg6[%c0_81, %c0_82, %c0_83] : memref<10x24x128xf32, #tpu.memory_space<vmem>>, vector<1x24x128xf32>
    %143 = vector.shape_cast %142 : vector<1x24x128xf32> to vector<24x128xf32>
    %144 = vector.shape_cast %141 : vector<24x128xf32> to vector<1x24x128xf32>
    tpu.vector_store %arg6[%c0_81, %c0_82, %c0_83], %144 {strides = array<i32>} : memref<10x24x128xf32, #tpu.memory_space<vmem>>, vector<1x24x128xf32>,
    %c1_84 = arith.constant 1 : index
    %c0_85 = arith.constant 0 : index
    %c0_86 = arith.constant 0 : index
    %145 = vector.load %arg6[%c1_84, %c0_85, %c0_86] : memref<10x24x128xf32, #tpu.memory_space<vmem>>, vector<1x24x128xf32>
    %146 = vector.shape_cast %145 : vector<1x24x128xf32> to vector<24x128xf32>
    %147 = arith.select %134, %146, %131 : vector<24x128xi1>, vector<24x128xf32>
    %c1_87 = arith.constant 1 : index
    %c0_88 = arith.constant 0 : index
    %c0_89 = arith.constant 0 : index
    %148 = vector.load %arg5[%c1_87, %c0_88, %c0_89] : memref<10x24x1xf32, #tpu.memory_space<vmem>>, vector<1x24x1xf32>
    %149 = vector.shape_cast %148 : vector<1x24x1xf32> to vector<24x1xf32>
    %150 = vector.broadcast %149 : vector<24x1xf32> to vector<24x128xf32>
    %151 = arith.mulf %147, %150 : vector<24x128xf32>
    %c1_90 = arith.constant 1 : index
    %c0_91 = arith.constant 0 : index
    %c0_92 = arith.constant 0 : index
    %152 = vector.load %arg6[%c1_90, %c0_91, %c0_92] : memref<10x24x128xf32, #tpu.memory_space<vmem>>, vector<1x24x128xf32>
    %153 = vector.shape_cast %152 : vector<1x24x128xf32> to vector<24x128xf32>
    %154 = vector.shape_cast %151 : vector<24x128xf32> to vector<1x24x128xf32>
    tpu.vector_store %arg6[%c1_90, %c0_91, %c0_92], %154 {strides = array<i32>} : memref<10x24x128xf32, #tpu.memory_space<vmem>>, vector<1x24x128xf32>,
    %c2_93 = arith.constant 2 : index
    %c0_94 = arith.constant 0 : index
    %c0_95 = arith.constant 0 : index
    %155 = vector.load %arg6[%c2_93, %c0_94, %c0_95] : memref<10x24x128xf32, #tpu.memory_space<vmem>>, vector<1x24x128xf32>
    %156 = vector.shape_cast %155 : vector<1x24x128xf32> to vector<24x128xf32>
    %157 = arith.select %134, %156, %131 : vector<24x128xi1>, vector<24x128xf32>
    %c2_96 = arith.constant 2 : index
    %c0_97 = arith.constant 0 : index
    %c0_98 = arith.constant 0 : index
    %158 = vector.load %arg5[%c2_96, %c0_97, %c0_98] : memref<10x24x1xf32, #tpu.memory_space<vmem>>, vector<1x24x1xf32>
    %159 = vector.shape_cast %158 : vector<1x24x1xf32> to vector<24x1xf32>
    %160 = vector.broadcast %159 : vector<24x1xf32> to vector<24x128xf32>
    %161 = arith.mulf %157, %160 : vector<24x128xf32>
    %c2_99 = arith.constant 2 : index
    %c0_100 = arith.constant 0 : index
    %c0_101 = arith.constant 0 : index
    %162 = vector.load %arg6[%c2_99, %c0_100, %c0_101] : memref<10x24x128xf32, #tpu.memory_space<vmem>>, vector<1x24x128xf32>
    %163 = vector.shape_cast %162 : vector<1x24x128xf32> to vector<24x128xf32>
    %164 = vector.shape_cast %161 : vector<24x128xf32> to vector<1x24x128xf32>
    tpu.vector_store %arg6[%c2_99, %c0_100, %c0_101], %164 {strides = array<i32>} : memref<10x24x128xf32, #tpu.memory_space<vmem>>, vector<1x24x128xf32>,
    %c3_102 = arith.constant 3 : index
    %c0_103 = arith.constant 0 : index
    %c0_104 = arith.constant 0 : index
    %165 = vector.load %arg6[%c3_102, %c0_103, %c0_104] : memref<10x24x128xf32, #tpu.memory_space<vmem>>, vector<1x24x128xf32>
    %166 = vector.shape_cast %165 : vector<1x24x128xf32> to vector<24x128xf32>
    %167 = arith.select %134, %166, %131 : vector<24x128xi1>, vector<24x128xf32>
    %c3_105 = arith.constant 3 : index
    %c0_106 = arith.constant 0 : index
    %c0_107 = arith.constant 0 : index
    %168 = vector.load %arg5[%c3_105, %c0_106, %c0_107] : memref<10x24x1xf32, #tpu.memory_space<vmem>>, vector<1x24x1xf32>
    %169 = vector.shape_cast %168 : vector<1x24x1xf32> to vector<24x1xf32>
    %170 = vector.broadcast %169 : vector<24x1xf32> to vector<24x128xf32>
    %171 = arith.mulf %167, %170 : vector<24x128xf32>
    %c3_108 = arith.constant 3 : index
    %c0_109 = arith.constant 0 : index
    %c0_110 = arith.constant 0 : index
    %172 = vector.load %arg6[%c3_108, %c0_109, %c0_110] : memref<10x24x128xf32, #tpu.memory_space<vmem>>, vector<1x24x128xf32>
    %173 = vector.shape_cast %172 : vector<1x24x128xf32> to vector<24x128xf32>
    %174 = vector.shape_cast %171 : vector<24x128xf32> to vector<1x24x128xf32>
    tpu.vector_store %arg6[%c3_108, %c0_109, %c0_110], %174 {strides = array<i32>} : memref<10x24x128xf32, #tpu.memory_space<vmem>>, vector<1x24x128xf32>,
    %c4_111 = arith.constant 4 : index
    %c0_112 = arith.constant 0 : index
    %c0_113 = arith.constant 0 : index
    %175 = vector.load %arg6[%c4_111, %c0_112, %c0_113] : memref<10x24x128xf32, #tpu.memory_space<vmem>>, vector<1x24x128xf32>
    %176 = vector.shape_cast %175 : vector<1x24x128xf32> to vector<24x128xf32>
    %177 = arith.select %134, %176, %131 : vector<24x128xi1>, vector<24x128xf32>
    %c4_114 = arith.constant 4 : index
    %c0_115 = arith.constant 0 : index
    %c0_116 = arith.constant 0 : index
    %178 = vector.load %arg5[%c4_114, %c0_115, %c0_116] : memref<10x24x1xf32, #tpu.memory_space<vmem>>, vector<1x24x1xf32>
    %179 = vector.shape_cast %178 : vector<1x24x1xf32> to vector<24x1xf32>
    %180 = vector.broadcast %179 : vector<24x1xf32> to vector<24x128xf32>
    %181 = arith.mulf %177, %180 : vector<24x128xf32>
    %c4_117 = arith.constant 4 : index
    %c0_118 = arith.constant 0 : index
    %c0_119 = arith.constant 0 : index
    %182 = vector.load %arg6[%c4_117, %c0_118, %c0_119] : memref<10x24x128xf32, #tpu.memory_space<vmem>>, vector<1x24x128xf32>
    %183 = vector.shape_cast %182 : vector<1x24x128xf32> to vector<24x128xf32>
    %184 = vector.shape_cast %181 : vector<24x128xf32> to vector<1x24x128xf32>
    tpu.vector_store %arg6[%c4_117, %c0_118, %c0_119], %184 {strides = array<i32>} : memref<10x24x128xf32, #tpu.memory_space<vmem>>, vector<1x24x128xf32>,
    %c5_120 = arith.constant 5 : index
    %c0_121 = arith.constant 0 : index
    %c0_122 = arith.constant 0 : index
    %185 = vector.load %arg6[%c5_120, %c0_121, %c0_122] : memref<10x24x128xf32, #tpu.memory_space<vmem>>, vector<1x24x128xf32>
    %186 = vector.shape_cast %185 : vector<1x24x128xf32> to vector<24x128xf32>
    %187 = arith.select %134, %186, %131 : vector<24x128xi1>, vector<24x128xf32>
    %c5_123 = arith.constant 5 : index
    %c0_124 = arith.constant 0 : index
    %c0_125 = arith.constant 0 : index
    %188 = vector.load %arg5[%c5_123, %c0_124, %c0_125] : memref<10x24x1xf32, #tpu.memory_space<vmem>>, vector<1x24x1xf32>
    %189 = vector.shape_cast %188 : vector<1x24x1xf32> to vector<24x1xf32>
    %190 = vector.broadcast %189 : vector<24x1xf32> to vector<24x128xf32>
    %191 = arith.mulf %187, %190 : vector<24x128xf32>
    %c5_126 = arith.constant 5 : index
    %c0_127 = arith.constant 0 : index
    %c0_128 = arith.constant 0 : index
    %192 = vector.load %arg6[%c5_126, %c0_127, %c0_128] : memref<10x24x128xf32, #tpu.memory_space<vmem>>, vector<1x24x128xf32>
    %193 = vector.shape_cast %192 : vector<1x24x128xf32> to vector<24x128xf32>
    %194 = vector.shape_cast %191 : vector<24x128xf32> to vector<1x24x128xf32>
    tpu.vector_store %arg6[%c5_126, %c0_127, %c0_128], %194 {strides = array<i32>} : memref<10x24x128xf32, #tpu.memory_space<vmem>>, vector<1x24x128xf32>,
    %c6_129 = arith.constant 6 : index
    %c0_130 = arith.constant 0 : index
    %c0_131 = arith.constant 0 : index
    %195 = vector.load %arg6[%c6_129, %c0_130, %c0_131] : memref<10x24x128xf32, #tpu.memory_space<vmem>>, vector<1x24x128xf32>
    %196 = vector.shape_cast %195 : vector<1x24x128xf32> to vector<24x128xf32>
    %197 = arith.select %134, %196, %131 : vector<24x128xi1>, vector<24x128xf32>
    %c6_132 = arith.constant 6 : index
    %c0_133 = arith.constant 0 : index
    %c0_134 = arith.constant 0 : index
    %198 = vector.load %arg5[%c6_132, %c0_133, %c0_134] : memref<10x24x1xf32, #tpu.memory_space<vmem>>, vector<1x24x1xf32>
    %199 = vector.shape_cast %198 : vector<1x24x1xf32> to vector<24x1xf32>
    %200 = vector.broadcast %199 : vector<24x1xf32> to vector<24x128xf32>
    %201 = arith.mulf %197, %200 : vector<24x128xf32>
    %c6_135 = arith.constant 6 : index
    %c0_136 = arith.constant 0 : index
    %c0_137 = arith.constant 0 : index
    %202 = vector.load %arg6[%c6_135, %c0_136, %c0_137] : memref<10x24x128xf32, #tpu.memory_space<vmem>>, vector<1x24x128xf32>
    %203 = vector.shape_cast %202 : vector<1x24x128xf32> to vector<24x128xf32>
    %204 = vector.shape_cast %201 : vector<24x128xf32> to vector<1x24x128xf32>
    tpu.vector_store %arg6[%c6_135, %c0_136, %c0_137], %204 {strides = array<i32>} : memref<10x24x128xf32, #tpu.memory_space<vmem>>, vector<1x24x128xf32>,
    %c7_138 = arith.constant 7 : index
    %c0_139 = arith.constant 0 : index
    %c0_140 = arith.constant 0 : index
    %205 = vector.load %arg6[%c7_138, %c0_139, %c0_140] : memref<10x24x128xf32, #tpu.memory_space<vmem>>, vector<1x24x128xf32>
    %206 = vector.shape_cast %205 : vector<1x24x128xf32> to vector<24x128xf32>
    %207 = arith.select %134, %206, %131 : vector<24x128xi1>, vector<24x128xf32>
    %c7_141 = arith.constant 7 : index
    %c0_142 = arith.constant 0 : index
    %c0_143 = arith.constant 0 : index
    %208 = vector.load %arg5[%c7_141, %c0_142, %c0_143] : memref<10x24x1xf32, #tpu.memory_space<vmem>>, vector<1x24x1xf32>
    %209 = vector.shape_cast %208 : vector<1x24x1xf32> to vector<24x1xf32>
    %210 = vector.broadcast %209 : vector<24x1xf32> to vector<24x128xf32>
    %211 = arith.mulf %207, %210 : vector<24x128xf32>
    %c7_144 = arith.constant 7 : index
    %c0_145 = arith.constant 0 : index
    %c0_146 = arith.constant 0 : index
    %212 = vector.load %arg6[%c7_144, %c0_145, %c0_146] : memref<10x24x128xf32, #tpu.memory_space<vmem>>, vector<1x24x128xf32>
    %213 = vector.shape_cast %212 : vector<1x24x128xf32> to vector<24x128xf32>
    %214 = vector.shape_cast %211 : vector<24x128xf32> to vector<1x24x128xf32>
    tpu.vector_store %arg6[%c7_144, %c0_145, %c0_146], %214 {strides = array<i32>} : memref<10x24x128xf32, #tpu.memory_space<vmem>>, vector<1x24x128xf32>,
    %c8_147 = arith.constant 8 : index
    %c0_148 = arith.constant 0 : index
    %c0_149 = arith.constant 0 : index
    %215 = vector.load %arg6[%c8_147, %c0_148, %c0_149] : memref<10x24x128xf32, #tpu.memory_space<vmem>>, vector<1x24x128xf32>
    %216 = vector.shape_cast %215 : vector<1x24x128xf32> to vector<24x128xf32>
    %217 = arith.select %134, %216, %131 : vector<24x128xi1>, vector<24x128xf32>
    %c8_150 = arith.constant 8 : index
    %c0_151 = arith.constant 0 : index
    %c0_152 = arith.constant 0 : index
    %218 = vector.load %arg5[%c8_150, %c0_151, %c0_152] : memref<10x24x1xf32, #tpu.memory_space<vmem>>, vector<1x24x1xf32>
    %219 = vector.shape_cast %218 : vector<1x24x1xf32> to vector<24x1xf32>
    %220 = vector.broadcast %219 : vector<24x1xf32> to vector<24x128xf32>
    %221 = arith.mulf %217, %220 : vector<24x128xf32>
    %c8_153 = arith.constant 8 : index
    %c0_154 = arith.constant 0 : index
    %c0_155 = arith.constant 0 : index
    %222 = vector.load %arg6[%c8_153, %c0_154, %c0_155] : memref<10x24x128xf32, #tpu.memory_space<vmem>>, vector<1x24x128xf32>
    %223 = vector.shape_cast %222 : vector<1x24x128xf32> to vector<24x128xf32>
    %224 = vector.shape_cast %221 : vector<24x128xf32> to vector<1x24x128xf32>
    tpu.vector_store %arg6[%c8_153, %c0_154, %c0_155], %224 {strides = array<i32>} : memref<10x24x128xf32, #tpu.memory_space<vmem>>, vector<1x24x128xf32>,
    %c9_156 = arith.constant 9 : index
    %c0_157 = arith.constant 0 : index
    %c0_158 = arith.constant 0 : index
    %225 = vector.load %arg6[%c9_156, %c0_157, %c0_158] : memref<10x24x128xf32, #tpu.memory_space<vmem>>, vector<1x24x128xf32>
    %226 = vector.shape_cast %225 : vector<1x24x128xf32> to vector<24x128xf32>
    %227 = arith.select %134, %226, %131 : vector<24x128xi1>, vector<24x128xf32>
    %c9_159 = arith.constant 9 : index
    %c0_160 = arith.constant 0 : index
    %c0_161 = arith.constant 0 : index
    %228 = vector.load %arg5[%c9_159, %c0_160, %c0_161] : memref<10x24x1xf32, #tpu.memory_space<vmem>>, vector<1x24x1xf32>
    %229 = vector.shape_cast %228 : vector<1x24x1xf32> to vector<24x1xf32>
    %230 = vector.broadcast %229 : vector<24x1xf32> to vector<24x128xf32>
    %231 = arith.mulf %227, %230 : vector<24x128xf32>
    %c9_162 = arith.constant 9 : index
    %c0_163 = arith.constant 0 : index
    %c0_164 = arith.constant 0 : index
    %232 = vector.load %arg6[%c9_162, %c0_163, %c0_164] : memref<10x24x128xf32, #tpu.memory_space<vmem>>, vector<1x24x128xf32>
    %233 = vector.shape_cast %232 : vector<1x24x128xf32> to vector<24x128xf32>
    %234 = vector.shape_cast %231 : vector<24x128xf32> to vector<1x24x128xf32>
    tpu.vector_store %arg6[%c9_162, %c0_163, %c0_164], %234 {strides = array<i32>} : memref<10x24x128xf32, #tpu.memory_space<vmem>>, vector<1x24x128xf32>,
    return
  }
  func.func @transform_0(%arg0: i32) -> (i32, i32, i32) {
    %c0_i32 = arith.constant 0 : i32
    %c0_i32_0 = arith.constant 0 : i32
    %c0_i32_1 = arith.constant 0 : i32
    return %c0_i32, %arg0, %c0_i32_0 : i32, i32, i32
  }
  func.func @transform_1(%arg0: i32) -> (i32, i32) {
    %c0_i32 = arith.constant 0 : i32
    %c0_i32_0 = arith.constant 0 : i32
    %c0_i32_1 = arith.constant 0 : i32
    return %c0_i32, %c0_i32_0 : i32, i32
  }
  func.func @transform_2(%arg0: i32) -> (i32, i32) {
    %c0_i32 = arith.constant 0 : i32
    %c0_i32_0 = arith.constant 0 : i32
    %c0_i32_1 = arith.constant 0 : i32
    return %c0_i32, %c0_i32_0 : i32, i32
  }
  func.func @transform_3(%arg0: i32) -> (i32, i32) {
    %c0_i32 = arith.constant 0 : i32
    %c0_i32_0 = arith.constant 0 : i32
    %c0_i32_1 = arith.constant 0 : i32
    return %c0_i32, %c0_i32_0 : i32, i32
  }
  func.func @transform_4(%arg0: i32) -> (i32, i32, i32) {
    %c0_i32 = arith.constant 0 : i32
    %c0_i32_0 = arith.constant 0 : i32
    %c0_i32_1 = arith.constant 0 : i32
    return %c0_i32, %arg0, %c0_i32_0 : i32, i32, i32
  }
  func.func @transform_5(%arg0: i32) -> (i32, i32, i32) {
    %c0_i32 = arith.constant 0 : i32
    %c0_i32_0 = arith.constant 0 : i32
    %c0_i32_1 = arith.constant 0 : i32
    return %c0_i32, %arg0, %c0_i32_0 : i32, i32, i32
  }
}

</mosaic_0001>

<bundles_post_ra>
// kernel: _lambda_.2
= control target key start
LH: loop header
LB: loop body
LE: loop exit
PB: predicated region body
PF: predicated region fallthrough
CT: control target
= control target key end

     0   :  { %vm954_vm0 = vcmask 1042432   ;;  %vm955_vm1 = vcmask 1043456   ;;  %vm947_vm2 = vcmask 56320   ;;  %v2101_v1 = vmov 65535   ;;  %s2288_s1 = inlined_call_operand.vmem [shape: bf16[7,128], index: 1, kind: input, shape index: {}]   ;;  %s2289_s0 = inlined_call_operand.vmem [shape: bf16[10,24,7], index: 0, kind: input, shape index: {}]   ;;  %s2290_s2 = inlined_call_operand.vmem [shape: f32[1,128], index: 2, kind: input, shape index: {}]   ;;  %s2291_s3 = inlined_call_operand.vmem [shape: f32[1,1,128], index: 3, kind: output, shape index: {0}]   ;;  %s2292_s4 = inlined_call_operand.vmem [shape: f32[1,1,128], index: 4, kind: output, shape index: {1}]  }
   0x1   :  { %v17_v0 = vld [vmem:[%s2288_s1] sm:$0xf]  ;;  %v956_v2 = vsel %vm954_vm0, 4294967295, %v2101_v1  ;;  %v2082_v5 = vld [vmem:[%s2289_s0 + $0xc] sm:$0xff]   ;;  %v2083_v7 = vld [vmem:[%s2289_s0 + $0x8] ss:$0 sps:$4 sm:$0xff]   ;;  %v913_v25 = vlaneseq }
   0x2   :  { %v2081_v3 = vld [vmem:[%s2289_s0] sm:$0xff]   ;;  %v957_v4 = vsel %vm955_vm1, %v956_v2, 0  ;;  %2027 = vmatprep.mubr.msk.bf16.mxu1 %vm947_vm2, %v2082_v5  ;;  %v2084_v8 = vld [vmem:[%s2289_s0 + $0x14] ss:$0 sps:$4 sm:$0xff]   ;;  %v2085_v9 = vld [vmem:[%s2289_s0 + $0x18] sm:$0xff]   ;;  %v2102_v29 = vmov 0.0  }
   0x3   :  { %v959_v6 = vand.u32 %v957_v4, %v17_v0  ;;  %2021 = vmatprep.mubr.msk.bf16.mxu0 %vm947_vm2, %v2081_v3  ;;  %v2086_v10 = vld [vmem:[%s2289_s0 + $0x24] sm:$0xff]   ;;  %v2087_v11 = vld [vmem:[%s2289_s0 + $0x20] ss:$0 sps:$4 sm:$0xff]   ;;  %v2088_v12 = vld [vmem:[%s2289_s0 + $0x2c] ss:$0 sps:$4 sm:$0xff]   ;;  %v914_v26 = vshrl.u32 %v913_v25, 7 }
   0x4   :  { %v2089_v13 = vld [vmem:[%s2289_s0 + $0x30] sm:$0xff]   ;;  %v2090_v14 = vld [vmem:[%s2289_s0 + $0x3c] sm:$0xff]   ;;  %v2091_v15 = vld [vmem:[%s2289_s0 + $0x38] ss:$0 sps:$4 sm:$0xff]  }
   0x5   :  { %2019 = vmatprep.subr.bf16.mxu0 %v959_v6  ;;  %2025 = vmatprep.subr.bf16.mxu1 %v959_v6  ;;  %v2092_v16 = vld [vmem:[%s2289_s0 + $0x44] ss:$0 sps:$4 sm:$0xff]   ;;  %v2093_v17 = vld [vmem:[%s2289_s0 + $0x48] sm:$0xff]   ;;  %v2094_v18 = vld [vmem:[%s2289_s0 + $0x54] sm:$0xff]   ;;  %v916_v27 = vadd.s32 16, %v914_v26 }
   0x6   :  { %2020 = vmatpush3.bf16.msra.mxu0 %v959_v6  ;;  %2026 = vmatpush3.bf16.msra.mxu1 %v959_v6  ;;  %v2095_v19 = vld [vmem:[%s2289_s0 + $0x50] ss:$0 sps:$4 sm:$0xff]   ;;  %v2096_v20 = vld [vmem:[%s2289_s0 + $0x5c] ss:$0 sps:$4 sm:$0xff]   ;;  %v2097_v21 = vld [vmem:[%s2289_s0 + $0x60] sm:$0xff]  }
   0x7   :  { %2031 = vmatprep.subr.bf16.mxu0 %v959_v6  ;;  %2037 = vmatprep.subr.bf16.mxu1 %v959_v6  ;;  %v2098_v22 = vld [vmem:[%s2289_s0 + $0x6c] sm:$0xff]   ;;  %v2099_v23 = vld [vmem:[%s2289_s0 + $0x68] ss:$0 sps:$4 sm:$0xff]   ;;  %v2100_v24 = vld [vmem:[%s2289_s0 + $0x74] ss:$0 sps:$4 sm:$0xff]   ;;  %vm923_vm3 = vcmp.lt.s32.totalorder %v916_v27, 20 }
   0x8   :  { %v2214_v28 = vld [vmem:[%s2290_s2] ss:$0 sm:$0xff]  ;;  %v2216_v30 = vsel %vm923_vm3, 1.0, %v2102_v29 }
   0x9   :  { %2022 = vmatmul.mubr.msk.bf16.vlgmr.msra.gmra.mrb[0].mxu0 %vm947_vm2, %v2083_v7  ;;  %2028 = vmatmul.mubr.msk.bf16.vlgmr.msra.gmra.mrb[0].mxu1 %vm947_vm2, %v2084_v8 }
   0xa   :  { %2032 = vmatpush3.bf16.msra.mxu0 %v959_v6  ;;  %2038 = vmatpush3.bf16.msra.mxu1 %v959_v6 }
   0xb   :  { %2033 = vmatprep.mubr.msk.bf16.mxu0 %vm947_vm2, %v2085_v9  ;;  %2039 = vmatprep.mubr.msk.bf16.mxu1 %vm947_vm2, %v2086_v10 }
   0xc   :  { %2043 = vmatprep.subr.bf16.mxu0 %v959_v6  ;;  %2049 = vmatprep.subr.bf16.mxu1 %v959_v6 }
  0x11   :  { %2034 = vmatmul.mubr.msk.bf16.vlgmr.msra.gmra.mrb[4].mxu0 %vm947_vm2, %v2087_v11  ;;  %2040 = vmatmul.mubr.msk.bf16.vlgmr.msra.gmra.mrb[4].mxu1 %vm947_vm2, %v2088_v12 }
  0x12   :  { %2044 = vmatpush3.bf16.msra.mxu0 %v959_v6  ;;  %2050 = vmatpush3.bf16.msra.mxu1 %v959_v6 }
  0x13   :  { %2045 = vmatprep.mubr.msk.bf16.mxu0 %vm947_vm2, %v2089_v13  ;;  %2051 = vmatprep.mubr.msk.bf16.mxu1 %vm947_vm2, %v2090_v14 }
  0x14   :  { %2055 = vmatprep.subr.bf16.mxu0 %v959_v6  ;;  %2061 = vmatprep.subr.bf16.mxu1 %v959_v6 }
  0x19   :  { %2046 = vmatmul.mubr.msk.bf16.vlgmr.msra.gmra.mrb[8].mxu0 %vm947_vm2, %v2091_v15  ;;  %2052 = vmatmul.mubr.msk.bf16.vlgmr.msra.gmra.mrb[8].mxu1 %vm947_vm2, %v2092_v16 }
  0x1a   :  { %2056 = vmatpush3.bf16.msra.mxu0 %v959_v6  ;;  %2062 = vmatpush3.bf16.msra.mxu1 %v959_v6 }
  0x1b   :  { %2057 = vmatprep.mubr.msk.bf16.mxu0 %vm947_vm2, %v2093_v17  ;;  %2063 = vmatprep.mubr.msk.bf16.mxu1 %vm947_vm2, %v2094_v18 }
  0x1c   :  { %2067 = vmatprep.subr.bf16.mxu0 %v959_v6  ;;  %2073 = vmatprep.subr.bf16.mxu1 %v959_v6 }
  0x21   :  { %2058 = vmatmul.mubr.msk.bf16.vlgmr.msra.gmra.mrb[12].mxu0 %vm947_vm2, %v2095_v19  ;;  %2064 = vmatmul.mubr.msk.bf16.vlgmr.msra.gmra.mrb[12].mxu1 %vm947_vm2, %v2096_v20 }
  0x22   :  { %2068 = vmatpush3.bf16.msra.mxu0 %v959_v6  ;;  %2074 = vmatpush3.bf16.msra.mxu1 %v959_v6 }
  0x23   :  { %2069 = vmatprep.mubr.msk.bf16.mxu0 %vm947_vm2, %v2097_v21  ;;  %2075 = vmatprep.mubr.msk.bf16.mxu1 %vm947_vm2, %v2098_v22 }
  0x29   :  { %2070 = vmatmul.mubr.msk.bf16.vlgmr.msra.gmra.mrb[16].mxu0 %vm947_vm2, %v2099_v23  ;;  %2076 = vmatmul.mubr.msk.bf16.vlgmr.msra.gmra.mrb[16].mxu1 %vm947_vm2, %v2100_v24 }
  0xdc   :  { %v2023_v31 = vpop.f32.mrb[0].mxu0  ;;  %v2029_v32 = vpop.f32.mrb[0].mxu1 }
  0xdd   :  { %v1004_v33 = vadd.f32 %v2023_v31, %v2214_v28  ;;  %v1094_v34 = vadd.f32 %v2029_v32, %v2214_v28  ;;  %v995_v35 = vpop.f32.mrb[1].mxu0  ;;  %v1085_v36 = vpop.f32.mrb[1].mxu1 }
  0xde   :  { %v996_v37 = vadd.f32 %v2214_v28, %v995_v35  ;;  %v1086_v38 = vadd.f32 %v2214_v28, %v1085_v36  ;;  %v2024_v39 = vpop.f32.mrb[2].mxu0  ;;  %v2030_v40 = vpop.f32.mrb[2].mxu1 }
  0xdf   :  { %v1011_v41 = vmul.f32 %v2216_v30, %v1004_v33  ;;  %v1101_v42 = vmul.f32 %v2216_v30, %v1094_v34  ;;  %v998_v43 = vpop.f32.mrb[3].mxu0  ;;  %v1088_v44 = vpop.f32.mrb[3].mxu1 }
  0xe0   :  { %v1111_v45 = vmul.f32 %v1086_v38, %v1086_v38  ;;  %v999_v46 = vadd.f32 %v2214_v28, %v998_v43  ;;  %v1089_v47 = vadd.f32 %v2214_v28, %v1088_v44  ;;  %v1021_v49 = vmul.f32 %v996_v37, %v996_v37 }
  0xe1   :  { %v1113_v48 = vmul.f32 %v1101_v42, %v1101_v42  ;;  %v1023_v54 = vmul.f32 %v1011_v41, %v1011_v41 }
  0xe2   :  { %v1012_v50 = vadd.f32 %v999_v46, %v996_v37  ;;  %v1022_v51 = vmul.f32 %v999_v46, %v999_v46  ;;  %v1102_v52 = vadd.f32 %v1089_v47, %v1086_v38  ;;  %v1112_v53 = vmul.f32 %v1089_v47, %v1089_v47 }
  0xe4   :  { %v1013_v55 = vadd.f32 %v1012_v50, %v1011_v41  ;;  %v1024_v56 = vadd.f32 %v1022_v51, %v1021_v49  ;;  %v1103_v57 = vadd.f32 %v1102_v52, %v1101_v42  ;;  %v1114_v58 = vadd.f32 %v1112_v53, %v1111_v45  ;;  %v2035_v59 = vpop.f32.mrb[4].mxu0  ;;  %v2041_v60 = vpop.f32.mrb[4].mxu1 }
  0xe5   :  { %v1184_v61 = vadd.f32 %v2035_v59, %v2214_v28  ;;  %v1274_v62 = vadd.f32 %v2041_v60, %v2214_v28  ;;  %v1175_v63 = vpop.f32.mrb[5].mxu0  ;;  %v1265_v0 = vpop.f32.mrb[5].mxu1 }
  0xe6   :  { %v1014_v1 = vrot.slane %v1013_v55, 4  ;;  %v1025_v2 = vadd.f32 %v1024_v56, %v1023_v54  ;;  %v1104_v3 = vrot.slane %v1103_v57, 4  ;;  %v1115_v4 = vadd.f32 %v1114_v58, %v1113_v48  ;;  %v2036_v5 = vpop.f32.mrb[6].mxu0  ;;  %v2042_v6 = vpop.f32.mrb[6].mxu1 }
  0xe7   :  { %v1191_v7 = vmul.f32 %v2216_v30, %v1184_v61  ;;  %v1281_v8 = vmul.f32 %v2216_v30, %v1274_v62  ;;  %v1176_v9 = vadd.f32 %v2214_v28, %v1175_v63  ;;  %v1266_v10 = vadd.f32 %v2214_v28, %v1265_v0  ;;  %v1178_v11 = vpop.f32.mrb[7].mxu0  ;;  %v1268_v12 = vpop.f32.mrb[7].mxu1 }
  0xe8   :  { %v1015_v13 = vadd.f32 %v1014_v1, %v1013_v55  ;;  %v1026_v14 = vrot.slane %v1025_v2, 4  ;;  %v1105_v15 = vadd.f32 %v1104_v3, %v1103_v57  ;;  %v1116_v16 = vrot.slane %v1115_v4, 4 }
  0xe9   :  { %v1203_v17 = vmul.f32 %v1191_v7, %v1191_v7  ;;  %v1293_v18 = vmul.f32 %v1281_v8, %v1281_v8  ;;  %v1201_v23 = vmul.f32 %v1176_v9, %v1176_v9  ;;  %v1291_v24 = vmul.f32 %v1266_v10, %v1266_v10 }
  0xea   :  { %v1016_v19 = vrot.slane %v1015_v13, 2  ;;  %v1027_v20 = vadd.f32 %v1026_v14, %v1025_v2  ;;  %v1106_v21 = vrot.slane %v1105_v15, 2  ;;  %v1117_v22 = vadd.f32 %v1116_v16, %v1115_v4 }
  0xeb   :  { %v1179_v25 = vadd.f32 %v2214_v28, %v1178_v11  ;;  %v1269_v26 = vadd.f32 %v2214_v28, %v1268_v12 }
  0xec   :  { %v1017_v27 = vadd.f32 %v1016_v19, %v1015_v13  ;;  %v1028_v29 = vrot.slane %v1027_v20, 2  ;;  %v1107_v31 = vadd.f32 %v1106_v21, %v1105_v15  ;;  %v1118_v32 = vrot.slane %v1117_v22, 2  ;;  %v2047_v33 = vpop.f32.mrb[8].mxu0  ;;  %v2053_v34 = vpop.f32.mrb[8].mxu1 }
  0xed   :  { %v1192_v35 = vadd.f32 %v1179_v25, %v1176_v9  ;;  %v1202_v36 = vmul.f32 %v1179_v25, %v1179_v25  ;;  %v1282_v37 = vadd.f32 %v1269_v26, %v1266_v10  ;;  %v1292_v38 = vmul.f32 %v1269_v26, %v1269_v26  ;;  %v1355_v39 = vpop.f32.mrb[9].mxu0  ;;  %v1445_v40 = vpop.f32.mrb[9].mxu1 }
  0xee   :  { %v1018_v41 = vrot.slane %v1017_v27, 1  ;;  %v1029_v42 = vadd.f32 %v1028_v29, %v1027_v20  ;;  %v1108_v43 = vrot.slane %v1107_v31, 1  ;;  %v1119_v44 = vadd.f32 %v1118_v32, %v1117_v22  ;;  %v2048_v45 = vpop.f32.mrb[10].mxu0  ;;  %v2054_v46 = vpop.f32.mrb[10].mxu1 }
  0xef   :  { %v1193_v47 = vadd.f32 %v1192_v35, %v1191_v7  ;;  %v1204_v48 = vadd.f32 %v1202_v36, %v1201_v23  ;;  %v1283_v49 = vadd.f32 %v1282_v37, %v1281_v8  ;;  %v1294_v50 = vadd.f32 %v1292_v38, %v1291_v24  ;;  %v1358_v51 = vpop.f32.mrb[11].mxu0  ;;  %v1448_v52 = vpop.f32.mrb[11].mxu1 }
  0xf0   :  { %v1019_v53 = vadd.f32 %v1018_v41, %v1017_v27  ;;  %v1030_v54 = vrot.slane %v1029_v42, 1  ;;  %v1109_v55 = vadd.f32 %v1108_v43, %v1107_v31  ;;  %v1120_v56 = vrot.slane %v1119_v44, 1 }
  0xf1   :  { %v1194_v57 = vrot.slane %v1193_v47, 4  ;;  %v1205_v58 = vadd.f32 %v1204_v48, %v1203_v17  ;;  %v1284_v59 = vrot.slane %v1283_v49, 4  ;;  %v1295_v60 = vadd.f32 %v1294_v50, %v1293_v18 }
  0xf2   :  { %v1031_v61 = vadd.f32 %v1030_v54, %v1029_v42  ;;  %v1110_v62 = vadd.f32 %v1109_v55, %v1019_v53  ;;  %v1121_v63 = vadd.f32 %v1120_v56, %v1119_v44  ;;  %v1364_v0 = vadd.f32 %v2047_v33, %v2214_v28 }
  0xf3   :  { %v1195_v1 = vadd.f32 %v1194_v57, %v1193_v47  ;;  %v1206_v2 = vrot.slane %v1205_v58, 4  ;;  %v1285_v3 = vadd.f32 %v1284_v59, %v1283_v49  ;;  %v1296_v4 = vrot.slane %v1295_v60, 4 }
  0xf4   :  { %v1122_v5 = vadd.f32 %v1121_v63, %v1031_v61  ;;  %v1371_v6 = vmul.f32 %v2216_v30, %v1364_v0  ;;  %v1454_v7 = vadd.f32 %v2053_v34, %v2214_v28  ;;  %v1356_v8 = vadd.f32 %v2214_v28, %v1355_v39  ;;  %v2059_v9 = vpop.f32.mrb[12].mxu0  ;;  %v2065_v10 = vpop.f32.mrb[12].mxu1 }
  0xf5   :  { %v1196_v11 = vrot.slane %v1195_v1, 2  ;;  %v1207_v12 = vadd.f32 %v1206_v2, %v1205_v58  ;;  %v1286_v13 = vrot.slane %v1285_v3, 2  ;;  %v1297_v14 = vadd.f32 %v1296_v4, %v1295_v60  ;;  %v1535_v15 = vpop.f32.mrb[13].mxu0  ;;  %v2238_v16 = vpop.f32.mrb[13].mxu1 }
  0xf6   :  { %v1383_v17 = vmul.f32 %v1371_v6, %v1371_v6  ;;  %v1461_v18 = vmul.f32 %v2216_v30, %v1454_v7  ;;  %v1381_v19 = vmul.f32 %v1356_v8, %v1356_v8  ;;  %v1446_v20 = vadd.f32 %v2214_v28, %v1445_v40  ;;  %v2060_v21 = vpop.f32.mrb[14].mxu0  ;;  %v2066_v22 = vpop.f32.mrb[14].mxu1 }
  0xf7   :  { %v1197_v23 = vadd.f32 %v1196_v11, %v1195_v1  ;;  %v1208_v24 = vrot.slane %v1207_v12, 2  ;;  %v1287_v25 = vadd.f32 %v1286_v13, %v1285_v3  ;;  %v1298_v26 = vrot.slane %v1297_v14, 2  ;;  %v1538_v27 = vpop.f32.mrb[15].mxu0  ;;  %v2242_v29 = vpop.f32.mrb[15].mxu1 }
  0xf8   :  { %v1473_v31 = vmul.f32 %v1461_v18, %v1461_v18  ;;  %v1471_v32 = vmul.f32 %v1446_v20, %v1446_v20  ;;  %v1359_v33 = vadd.f32 %v2214_v28, %v1358_v51  ;;  %v1449_v34 = vadd.f32 %v2214_v28, %v1448_v52 }
  0xf9   :  { %v1198_v35 = vrot.slane %v1197_v23, 1  ;;  %v1209_v36 = vadd.f32 %v1208_v24, %v1207_v12  ;;  %v1288_v37 = vrot.slane %v1287_v25, 1  ;;  %v1299_v38 = vadd.f32 %v1298_v26, %v1297_v14 }
  0xfa   :  { %v1372_v39 = vadd.f32 %v1359_v33, %v1356_v8  ;;  %v1382_v40 = vmul.f32 %v1359_v33, %v1359_v33  ;;  %v1462_v41 = vadd.f32 %v1449_v34, %v1446_v20  ;;  %v1472_v42 = vmul.f32 %v1449_v34, %v1449_v34 }
  0xfb   :  { %v1199_v43 = vadd.f32 %v1198_v35, %v1197_v23  ;;  %v1210_v44 = vrot.slane %v1209_v36, 1  ;;  %v1289_v45 = vadd.f32 %v1288_v37, %v1287_v25  ;;  %v1300_v46 = vrot.slane %v1299_v38, 1 }
  0xfc   :  { %v1373_v47 = vadd.f32 %v1372_v39, %v1371_v6  ;;  %v1384_v48 = vadd.f32 %v1382_v40, %v1381_v19  ;;  %v1463_v49 = vadd.f32 %v1462_v41, %v1461_v18  ;;  %v1474_v50 = vadd.f32 %v1472_v42, %v1471_v32  ;;  %v2246_v53 = vpop.f32.mrb[16].mxu0  ;;  %v2248_v51 = vpop.f32.mrb[16].mxu1 }
  0xfd   :  { %v1200_v52 = vadd.f32 %v1199_v43, %v1110_v62  ;;  %v1211_v54 = vadd.f32 %v1210_v44, %v1209_v36  ;;  %v1301_v55 = vadd.f32 %v1300_v46, %v1299_v38  ;;  %v1544_v56 = vadd.f32 %v2059_v9, %v2214_v28  ;;  %v2251_v57 = vpop.f32.mrb[17].mxu0  ;;  %v2253_v58 = vpop.f32.mrb[17].mxu1 }
  0xfe   :  { %v1374_v59 = vrot.slane %v1373_v47, 4  ;;  %v1385_v60 = vadd.f32 %v1384_v48, %v1383_v17  ;;  %v1464_v61 = vrot.slane %v1463_v49, 4  ;;  %v1475_v63 = vadd.f32 %v1474_v50, %v1473_v31  ;;  %v2072_v0 = vpop.f32.mrb[18].mxu0  ;;  %v2078_v1 = vpop.f32.mrb[18].mxu1 }
  0xff   :  { %v1212_v2 = vadd.f32 %v1211_v54, %v1122_v5  ;;  %v1290_v3 = vadd.f32 %v1289_v45, %v1200_v52  ;;  %v1551_v4 = vmul.f32 %v2216_v30, %v1544_v56  ;;  %v1634_v62 = vadd.f32 %v2065_v10, %v2214_v28  ;;  %v2257_v6 = vpop.f32.mrb[19].mxu0  ;;  %v2259_v7 = vpop.f32.mrb[19].mxu1 }
 0x100   :  { %v1375_v8 = vadd.f32 %v1374_v59, %v1373_v47  ;;  %v1386_v9 = vrot.slane %v1385_v60, 4  ;;  %v1465_v11 = vadd.f32 %v1464_v61, %v1463_v49  ;;  %v1476_v12 = vrot.slane %v1475_v63, 4 }
 0x101   :  { %v1302_v13 = vadd.f32 %v1301_v55, %v1212_v2  ;;  %v1563_v14 = vmul.f32 %v1551_v4, %v1551_v4  ;;  %v1641_v17 = vmul.f32 %v2216_v30, %v1634_v62  ;;  %v1536_v18 = vadd.f32 %v2214_v28, %v1535_v15 }
 0x102   :  { %v1376_v5 = vrot.slane %v1375_v8, 2  ;;  %v1387_v19 = vadd.f32 %v1386_v9, %v1385_v60  ;;  %v1466_v20 = vrot.slane %v1465_v11, 2  ;;  %v1477_v21 = vadd.f32 %v1476_v12, %v1475_v63 }
 0x103   :  { %v1653_v22 = vmul.f32 %v1641_v17, %v1641_v17  ;;  %v1561_v10 = vmul.f32 %v1536_v18, %v1536_v18  ;;  %v1626_v23 = vadd.f32 %v2214_v28, %v2238_v16  ;;  %v1539_v24 = vadd.f32 %v2214_v28, %v1538_v27 }
 0x104   :  { %v1377_v25 = vadd.f32 %v1376_v5, %v1375_v8  ;;  %v1388_v26 = vrot.slane %v1387_v19, 2  ;;  %v1467_v31 = vadd.f32 %v1466_v20, %v1465_v11  ;;  %v1478_v32 = vrot.slane %v1477_v21, 2 }
 0x105   :  { %v1651_v33 = vmul.f32 %v1626_v23, %v1626_v23  ;;  %v1552_v34 = vadd.f32 %v1539_v24, %v1536_v18  ;;  %v1562_v35 = vmul.f32 %v1539_v24, %v1539_v24  ;;  %v1629_v15 = vadd.f32 %v2214_v28, %v2242_v29 }
 0x106   :  { %v1378_v36 = vrot.slane %v1377_v25, 1  ;;  %v1389_v37 = vadd.f32 %v1388_v26, %v1387_v19  ;;  %v1468_v38 = vrot.slane %v1467_v31, 1  ;;  %v1479_v39 = vadd.f32 %v1478_v32, %v1477_v21 }
 0x107   :  { %v1553_v40 = vadd.f32 %v1552_v34, %v1551_v4  ;;  %v1564_v41 = vadd.f32 %v1562_v35, %v1561_v10  ;;  %v1642_v42 = vadd.f32 %v1629_v15, %v1626_v23  ;;  %v1652_v16 = vmul.f32 %v1629_v15, %v1629_v15 }
 0x108   :  { %v1379_v43 = vadd.f32 %v1378_v36, %v1377_v25  ;;  %v1390_v27 = vrot.slane %v1389_v37, 1  ;;  %v1469_v44 = vadd.f32 %v1468_v38, %v1467_v31  ;;  %v1480_v45 = vrot.slane %v1479_v39, 1 }
 0x109   :  { %v1554_v46 = vrot.slane %v1553_v40, 4  ;;  %v1565_v47 = vadd.f32 %v1564_v41, %v1563_v14  ;;  %v1643_v48 = vadd.f32 %v1642_v42, %v1641_v17  ;;  %v1654_v49 = vadd.f32 %v1652_v16, %v1651_v33 }
 0x10a   :  { %v1380_v50 = vadd.f32 %v1379_v43, %v1290_v3  ;;  %v1391_v52 = vadd.f32 %v1390_v27, %v1389_v37  ;;  %v1481_v54 = vadd.f32 %v1480_v45, %v1479_v39  ;;  %v1724_v29 = vadd.f32 %v2246_v53, %v2214_v28 }
 0x10b   :  { %v1555_v55 = vadd.f32 %v1554_v46, %v1553_v40  ;;  %v1566_v56 = vrot.slane %v1565_v47, 4  ;;  %v1644_v59 = vrot.slane %v1643_v48, 4  ;;  %v1655_v60 = vadd.f32 %v1654_v49, %v1653_v22 }
 0x10c   :  { %v1392_v61 = vadd.f32 %v1391_v52, %v1302_v13  ;;  %v1470_v63 = vadd.f32 %v1469_v44, %v1380_v50  ;;  %v1731_v0 = vmul.f32 %v2216_v30, %v1724_v29  ;;  %v1814_v1 = vadd.f32 %v2248_v51, %v2214_v28 }
 0x10d   :  { %v1556_v2 = vrot.slane %v1555_v55, 2  ;;  %v1567_v4 = vadd.f32 %v1566_v56, %v1565_v47  ;;  %v1645_v62 = vadd.f32 %v1644_v59, %v1643_v48  ;;  %v1656_v3 = vrot.slane %v1655_v60, 4 }
 0x10e   :  { %v1482_v8 = vadd.f32 %v1481_v54, %v1392_v61  ;;  %v1743_v9 = vmul.f32 %v1731_v0, %v1731_v0  ;;  %v1821_v11 = vmul.f32 %v2216_v30, %v1814_v1  ;;  %v1716_v53 = vadd.f32 %v2214_v28, %v2251_v57 }
 0x10f   :  { %v1557_v12 = vadd.f32 %v1556_v2, %v1555_v55  ;;  %v1568_v14 = vrot.slane %v1567_v4, 2  ;;  %v1646_v13 = vrot.slane %v1645_v62, 2  ;;  %v1657_v17 = vadd.f32 %v1656_v3, %v1655_v60 }
 0x110   :  { %v1833_v18 = vmul.f32 %v1821_v11, %v1821_v11  ;;  %v1741_v5 = vmul.f32 %v1716_v53, %v1716_v53  ;;  %v1806_v51 = vadd.f32 %v2214_v28, %v2253_v58  ;;  %v1719_v19 = vadd.f32 %v2214_v28, %v2257_v6 }
 0x111   :  { %v1558_v20 = vrot.slane %v1557_v12, 1  ;;  %v1569_v21 = vadd.f32 %v1568_v14, %v1567_v4  ;;  %v1647_v22 = vadd.f32 %v1646_v13, %v1645_v62  ;;  %v1658_v10 = vrot.slane %v1657_v17, 2 }
 0x112   :  { %v1831_v30 = vmul.f32 %v1806_v51, %v1806_v51  ;;  %v1732_v23 = vadd.f32 %v1719_v19, %v1716_v53  ;;  %v1742_v24 = vmul.f32 %v1719_v19, %v1719_v19  ;;  %v1809_v57 = vadd.f32 %v2214_v28, %v2259_v7 }
 0x113   :  { %v1559_v25 = vadd.f32 %v1558_v20, %v1557_v12  ;;  %v1570_v26 = vrot.slane %v1569_v21, 1  ;;  %v1648_v31 = vrot.slane %v1647_v22, 1  ;;  %v1659_v32 = vadd.f32 %v1658_v10, %v1657_v17 }
 0x114   :  { %v1733_v33 = vadd.f32 %v1732_v23, %v1731_v0  ;;  %v1744_v34 = vadd.f32 %v1742_v24, %v1741_v5  ;;  %v1822_v58 = vadd.f32 %v1809_v57, %v1806_v51  ;;  %v1832_v35 = vmul.f32 %v1809_v57, %v1809_v57 }
 0x115   :  { %v1560_v15 = vadd.f32 %v1559_v25, %v1470_v63  ;;  %v1571_v6 = vadd.f32 %v1570_v26, %v1569_v21  ;;  %v1649_v36 = vadd.f32 %v1648_v31, %v1647_v22  ;;  %v1660_v37 = vrot.slane %v1659_v32, 1 }
 0x116   :  { %v1734_v38 = vrot.slane %v1733_v33, 4  ;;  %v1745_v39 = vadd.f32 %v1744_v34, %v1743_v9  ;;  %v1823_v40 = vadd.f32 %v1822_v58, %v1821_v11  ;;  %v1834_v41 = vadd.f32 %v1832_v35, %v1831_v30 }
 0x117   :  { %v1572_v42 = vadd.f32 %v1571_v6, %v1482_v8  ;;  %v1650_v16 = vadd.f32 %v1649_v36, %v1560_v15  ;;  %v1661_v43 = vadd.f32 %v1660_v37, %v1659_v32 }
 0x118   :  { %v1735_v28 = vadd.f32 %v1734_v38, %v1733_v33  ;;  %v1746_v7 = vrot.slane %v1745_v39, 4  ;;  %v1824_v27 = vrot.slane %v1823_v40, 4  ;;  %v1835_v44 = vadd.f32 %v1834_v41, %v1833_v18 }
 0x119   :  { %v1662_v45 = vadd.f32 %v1661_v43, %v1572_v42 }
 0x11a   :  { %v1736_v46 = vrot.slane %v1735_v28, 2  ;;  %v1747_v47 = vadd.f32 %v1746_v7, %v1745_v39  ;;  %v1825_v48 = vadd.f32 %v1824_v27, %v1823_v40  ;;  %v1836_v49 = vrot.slane %v1835_v44, 4 }
 0x11c   :  { %v1737_v50 = vadd.f32 %v1736_v46, %v1735_v28  ;;  %v1748_v52 = vrot.slane %v1747_v47, 2  ;;  %v1826_v54 = vrot.slane %v1825_v48, 2  ;;  %v1837_v29 = vadd.f32 %v1836_v49, %v1835_v44 }
 0x11e   :  { %v1738_v55 = vrot.slane %v1737_v50, 1  ;;  %v1749_v56 = vadd.f32 %v1748_v52, %v1747_v47  ;;  %v1827_v59 = vadd.f32 %v1826_v54, %v1825_v48  ;;  %v1838_v60 = vrot.slane %v1837_v29, 2 }
 0x120   :  { %v1739_v61 = vadd.f32 %v1738_v55, %v1737_v50  ;;  %v1750_v63 = vrot.slane %v1749_v56, 1  ;;  %v1828_v0 = vrot.slane %v1827_v59, 1  ;;  %v1839_v1 = vadd.f32 %v1838_v60, %v1837_v29 }
 0x122   :  { %v1740_v2 = vadd.f32 %v1739_v61, %v1650_v16  ;;  %v1751_v4 = vadd.f32 %v1750_v63, %v1749_v56  ;;  %v1829_v62 = vadd.f32 %v1828_v0, %v1827_v59  ;;  %v1840_v3 = vrot.slane %v1839_v1, 1 }
 0x124   :  { %v1752_v8 = vadd.f32 %v1751_v4, %v1662_v45  ;;  %v1830_v9 = vadd.f32 %v1829_v62, %v1740_v2  ;;  %v1841_v11 = vadd.f32 %v1840_v3, %v1839_v1 }
 0x126   :  { %v1842_v53 = vadd.f32 %v1841_v11, %v1752_v8  ;;  %1843 = vst [vmem:[%s2291_s3] sm:$0x1] %v1830_v9 }
 0x128   :  { %1844 = vst [vmem:[%s2292_s4] sm:$0x1] %v1842_v53 }

// kernel: _lambda_.3
= control target key start
LH: loop header
LB: loop body
LE: loop exit
PB: predicated region body
PF: predicated region fallthrough
CT: control target
= control target key end

     0   :  { %vm42_vm0 = vcmask 1042432   ;;  %vm43_vm1 = vcmask 1043456   ;;  %vm35_vm2 = vcmask 56320   ;;  %v1466_v1 = vmov 65535   ;;  %s2193_s1 = inlined_call_operand.vmem [shape: bf16[7,128], index: 1, kind: input, shape index: {}]   ;;  %s2194_s0 = inlined_call_operand.vmem [shape: bf16[10,24,7], index: 0, kind: input, shape index: {}]   ;;  %s2195_s4 = inlined_call_operand.vmem [shape: f32[10,24,1], index: 4, kind: input, shape index: {}]   ;;  %s2196_s2 = inlined_call_operand.vmem [shape: f32[1,128], index: 2, kind: input, shape index: {}]   ;;  %s2197_s3 = inlined_call_operand.vmem [shape: f32[1,128], index: 3, kind: input, shape index: {}]   ;;  %s2198_s5 = inlined_call_operand.vmem [shape: f32[10,24,128], index: 5, kind: output, shape index: {}]  }
   0x1   :  { %v21_v0 = vld [vmem:[%s2193_s1] sm:$0xf]  ;;  %v44_v2 = vsel %vm42_vm0, 4294967295, %v1466_v1  ;;  %v1447_v5 = vld [vmem:[%s2194_s0 + $0xc] sm:$0xff]   ;;  %v1448_v7 = vld [vmem:[%s2194_s0 + $0x8] ss:$0 sps:$4 sm:$0xff]  }
   0x2   :  { %v1446_v3 = vld [vmem:[%s2194_s0] sm:$0xff]   ;;  %v45_v4 = vsel %vm43_vm1, %v44_v2, 0  ;;  %1390 = vmatprep.mubr.msk.bf16.mxu1 %vm35_vm2, %v1447_v5  ;;  %v1449_v8 = vld [vmem:[%s2194_s0 + $0x14] ss:$0 sps:$4 sm:$0xff]   ;;  %v1450_v9 = vld [vmem:[%s2194_s0 + $0x18] sm:$0xff]   ;;  %v1467_v11 = vmov 0  }
   0x3   :  { %v1507_v6 = vand.u32 %v45_v4, %v21_v0  ;;  %1384 = vmatprep.mubr.msk.bf16.mxu0 %vm35_vm2, %v1446_v3  ;;  %v1451_v10 = vld [vmem:[%s2194_s0 + $0x24] sm:$0xff]   ;;  %1445 = vset.pattern.permute.xlu1 %v1467_v11  ;;  %v870_v12 = vld [vmem:[%s2195_s4 + $0x10] sm:$0xff]  ;;  %v1452_v14 = vld [vmem:[%s2194_s0 + $0x20] ss:$0 sps:$4 sm:$0xff]  }
   0x4   :  { %1444 = vset.pattern.permute.xlu0 %v1467_v11  ;;  %v868_v13 = vld [vmem:[%s2195_s4] sm:$0xff]  ;;  %v1453_v15 = vld [vmem:[%s2194_s0 + $0x2c] ss:$0 sps:$4 sm:$0xff]   ;;  %883 = vperm.xlu1 %1445, %v870_v12   ;;  %v1454_v16 = vld [vmem:[%s2194_s0 + $0x30] sm:$0xff]  }
   0x5   :  { %1382 = vmatprep.subr.bf16.mxu0 %v1507_v6  ;;  %1388 = vmatprep.subr.bf16.mxu1 %v1507_v6  ;;  %v1455_v17 = vld [vmem:[%s2194_s0 + $0x3c] sm:$0xff]   ;;  %v869_v19 = vld [vmem:[%s2195_s4 + $0x8] sm:$0xff]  ;;  %v1456_v20 = vld [vmem:[%s2194_s0 + $0x38] ss:$0 sps:$4 sm:$0xff]  }
   0x6   :  { %1383 = vmatpush3.bf16.msra.mxu0 %v1507_v6  ;;  %1389 = vmatpush3.bf16.msra.mxu1 %v1507_v6  ;;  %v1274_v18 = vld [vmem:[%s2195_s4 + $0x18] sm:$0xff]  ;;  %v1457_v21 = vld [vmem:[%s2194_s0 + $0x44] ss:$0 sps:$4 sm:$0xff]   ;;  %v1458_v22 = vld [vmem:[%s2194_s0 + $0x48] sm:$0xff]  }
   0x7   :  { %1394 = vmatprep.subr.bf16.mxu0 %v1507_v6  ;;  %1400 = vmatprep.subr.bf16.mxu1 %v1507_v6  ;;  %v1459_v23 = vld [vmem:[%s2194_s0 + $0x54] sm:$0xff]   ;;  %v1276_v24 = vld [vmem:[%s2195_s4 + $0x28] sm:$0xff]  ;;  %v1275_v25 = vld [vmem:[%s2195_s4 + $0x20] sm:$0xff] }
   0x8   :  { %873 = vperm.xlu0 %1444, %v868_v13   ;;  %904 = vperm.xlu1 %1445, %v1274_v18   ;;  %v1460_v26 = vld [vmem:[%s2194_s0 + $0x50] ss:$0 sps:$4 sm:$0xff]   ;;  %v1461_v27 = vld [vmem:[%s2194_s0 + $0x5c] ss:$0 sps:$4 sm:$0xff]   ;;  %v1462_v28 = vld [vmem:[%s2194_s0 + $0x60] sm:$0xff]  }
   0x9   :  { %1385 = vmatmul.mubr.msk.bf16.vlgmr.msra.gmra.mrb[0].mxu0 %vm35_vm2, %v1448_v7  ;;  %1391 = vmatmul.mubr.msk.bf16.vlgmr.msra.gmra.mrb[0].mxu1 %vm35_vm2, %v1449_v8  ;;  %v1463_v29 = vld [vmem:[%s2194_s0 + $0x6c] sm:$0xff]   ;;  %v1284_v30 = vld [vmem:[%s2195_s4 + $0x38] sm:$0xff]  ;;  %v1464_v32 = vld [vmem:[%s2194_s0 + $0x68] ss:$0 sps:$4 sm:$0xff]  }
   0xa   :  { %1395 = vmatpush3.bf16.msra.mxu0 %v1507_v6  ;;  %1401 = vmatpush3.bf16.msra.mxu1 %v1507_v6  ;;  %v1283_v31 = vld [vmem:[%s2195_s4 + $0x30] sm:$0xff]  ;;  %v1292_v34 = vld [vmem:[%s2195_s4 + $0x48] sm:$0xff]  ;;  %v1285_v35 = vld [vmem:[%s2195_s4 + $0x40] sm:$0xff] }
   0xb   :  { %1396 = vmatprep.mubr.msk.bf16.mxu0 %vm35_vm2, %v1450_v9  ;;  %1402 = vmatprep.mubr.msk.bf16.mxu1 %vm35_vm2, %v1451_v10  ;;  %v1465_v33 = vld [vmem:[%s2194_s0 + $0x74] ss:$0 sps:$4 sm:$0xff]   ;;  %v1294_v36 = vld [vmem:[%s2195_s4 + $0x58] sm:$0xff]  ;;  %v1302_v38 = vld [vmem:[%s2195_s4 + $0x68] sm:$0xff] }
   0xc   :  { %1406 = vmatprep.subr.bf16.mxu0 %v1507_v6  ;;  %1412 = vmatprep.subr.bf16.mxu1 %v1507_v6  ;;  %v1293_v37 = vld [vmem:[%s2195_s4 + $0x50] sm:$0xff]  ;;  %v1301_v39 = vld [vmem:[%s2195_s4 + $0x60] sm:$0xff]  ;;  %v1310_v40 = vld [vmem:[%s2195_s4 + $0x78] sm:$0xff] }
   0xd   :  { %878 = vperm.xlu0 %1444, %v869_v19   ;;  %914 = vperm.xlu1 %1445, %v1276_v24   ;;  %v1303_v41 = vld [vmem:[%s2195_s4 + $0x70] sm:$0xff]  ;;  %v1312_v42 = vld [vmem:[%s2195_s4 + $0x88] sm:$0xff]  ;;  %v1311_v43 = vld [vmem:[%s2195_s4 + $0x80] sm:$0xff] }
   0xe   :  { %v1320_v44 = vld [vmem:[%s2195_s4 + $0x98] sm:$0xff]  ;;  %v1319_v45 = vld [vmem:[%s2195_s4 + $0x90] sm:$0xff]  ;;  %v1328_v46 = vld [vmem:[%s2195_s4 + $0xa8] sm:$0xff] }
   0xf   :  { %v1321_v47 = vld [vmem:[%s2195_s4 + $0xa0] sm:$0xff]  ;;  %v1330_v48 = vld [vmem:[%s2195_s4 + $0xb8] sm:$0xff]  ;;  %v1329_v49 = vld [vmem:[%s2195_s4 + $0xb0] sm:$0xff] }
  0x10   :  { %v1338_v50 = vld [vmem:[%s2195_s4 + $0xc8] sm:$0xff]  ;;  %v1337_v51 = vld [vmem:[%s2195_s4 + $0xc0] sm:$0xff]  ;;  %v1346_v52 = vld [vmem:[%s2195_s4 + $0xd8] sm:$0xff] }
  0x11   :  { %1397 = vmatmul.mubr.msk.bf16.vlgmr.msra.gmra.mrb[4].mxu0 %vm35_vm2, %v1452_v14  ;;  %1403 = vmatmul.mubr.msk.bf16.vlgmr.msra.gmra.mrb[4].mxu1 %vm35_vm2, %v1453_v15  ;;  %v1339_v53 = vld [vmem:[%s2195_s4 + $0xd0] sm:$0xff]  ;;  %v1348_v54 = vld [vmem:[%s2195_s4 + $0xe8] sm:$0xff]  ;;  %v1347_v55 = vld [vmem:[%s2195_s4 + $0xe0] sm:$0xff] }
  0x12   :  { %1407 = vmatpush3.bf16.msra.mxu0 %v1507_v6  ;;  %1413 = vmatpush3.bf16.msra.mxu1 %v1507_v6  ;;  %v1726_v7 = vld [vmem:[%s2196_s2] ss:$0 sm:$0xff] }
  0x13   :  { %1408 = vmatprep.mubr.msk.bf16.mxu0 %vm35_vm2, %v1454_v16  ;;  %1414 = vmatprep.mubr.msk.bf16.mxu1 %vm35_vm2, %v1455_v17  ;;  %v1735_v10 = vld [vmem:[%s2197_s3] ss:$0 sm:$0xff] }
  0x14   :  { %1418 = vmatprep.subr.bf16.mxu0 %v1507_v6  ;;  %1424 = vmatprep.subr.bf16.mxu1 %v1507_v6 }
  0x15   :  { %909 = vperm.xlu0 %1444, %v1275_v25   ;;  %940 = vperm.xlu1 %1445, %v1284_v30  }
  0x19   :  { %1409 = vmatmul.mubr.msk.bf16.vlgmr.msra.gmra.mrb[8].mxu0 %vm35_vm2, %v1456_v20  ;;  %1415 = vmatmul.mubr.msk.bf16.vlgmr.msra.gmra.mrb[8].mxu1 %vm35_vm2, %v1457_v21 }
  0x1a   :  { %1419 = vmatpush3.bf16.msra.mxu0 %v1507_v6  ;;  %1425 = vmatpush3.bf16.msra.mxu1 %v1507_v6 }
  0x1b   :  { %1420 = vmatprep.mubr.msk.bf16.mxu0 %vm35_vm2, %v1458_v22  ;;  %1426 = vmatprep.mubr.msk.bf16.mxu1 %vm35_vm2, %v1459_v23 }
  0x1c   :  { %1430 = vmatprep.subr.bf16.mxu0 %v1507_v6  ;;  %1436 = vmatprep.subr.bf16.mxu1 %v1507_v6 }
  0x1d   :  { %935 = vperm.xlu0 %1444, %v1283_v31   ;;  %966 = vperm.xlu1 %1445, %v1292_v34  }
  0x21   :  { %1421 = vmatmul.mubr.msk.bf16.vlgmr.msra.gmra.mrb[12].mxu0 %vm35_vm2, %v1460_v26  ;;  %1427 = vmatmul.mubr.msk.bf16.vlgmr.msra.gmra.mrb[12].mxu1 %vm35_vm2, %v1461_v27 }
  0x22   :  { %1431 = vmatpush3.bf16.msra.mxu0 %v1507_v6  ;;  %1437 = vmatpush3.bf16.msra.mxu1 %v1507_v6 }
  0x23   :  { %1432 = vmatprep.mubr.msk.bf16.mxu0 %vm35_vm2, %v1462_v28  ;;  %1438 = vmatprep.mubr.msk.bf16.mxu1 %vm35_vm2, %v1463_v29 }
  0x24   :  { %945 = vperm.xlu0 %1444, %v1285_v35   ;;  %976 = vperm.xlu1 %1445, %v1294_v36  }
  0x28   :  { %971 = vperm.xlu0 %1444, %v1293_v37   ;;  %1002 = vperm.xlu1 %1445, %v1302_v38  }
  0x29   :  { %1433 = vmatmul.mubr.msk.bf16.vlgmr.msra.gmra.mrb[16].mxu0 %vm35_vm2, %v1464_v32  ;;  %1439 = vmatmul.mubr.msk.bf16.vlgmr.msra.gmra.mrb[16].mxu1 %vm35_vm2, %v1465_v33 }
  0x2c   :  { %997 = vperm.xlu0 %1444, %v1301_v39   ;;  %1028 = vperm.xlu1 %1445, %v1310_v40  }
  0x30   :  { %1007 = vperm.xlu0 %1444, %v1303_v41   ;;  %1038 = vperm.xlu1 %1445, %v1312_v42  }
  0x34   :  { %1033 = vperm.xlu0 %1444, %v1311_v43   ;;  %1064 = vperm.xlu1 %1445, %v1320_v44  }
  0x38   :  { %1059 = vperm.xlu0 %1444, %v1319_v45   ;;  %1090 = vperm.xlu1 %1445, %v1328_v46  }
  0x3c   :  { %1069 = vperm.xlu0 %1444, %v1321_v47   ;;  %1100 = vperm.xlu1 %1445, %v1330_v48  }
  0x40   :  { %1095 = vperm.xlu0 %1444, %v1329_v49   ;;  %1126 = vperm.xlu1 %1445, %v1338_v50  }
  0x44   :  { %1121 = vperm.xlu0 %1444, %v1337_v51   ;;  %1152 = vperm.xlu1 %1445, %v1346_v52  }
  0x48   :  { %1131 = vperm.xlu0 %1444, %v1339_v53   ;;  %1162 = vperm.xlu1 %1445, %v1348_v54  }
  0x4c   :  { %1157 = vperm.xlu0 %1444, %v1347_v55  }
  0x83   :  { %v1693_v56 = vpop.permute.xlu1 %883 }
  0x87   :  { %v1695_v57 = vpop.permute.xlu0 %873  ;;  %v1697_v58 = vpop.permute.xlu1 %904 }
  0x8c   :  { %v1699_v59 = vpop.permute.xlu0 %878  ;;  %v1701_v60 = vpop.permute.xlu1 %914 }
  0x94   :  { %v1703_v61 = vpop.permute.xlu0 %909  ;;  %v1705_v62 = vpop.permute.xlu1 %940 }
  0x95   :  { %2223 = vst [vmem:[#allocation2_spill] sm:$0xff] %v1705_v62 }
  0x9c   :  { %v1707_v63 = vpop.permute.xlu0 %935  ;;  %v1709_v0 = vpop.permute.xlu1 %966 }
  0xa3   :  { %v1711_v1 = vpop.permute.xlu0 %945  ;;  %v1713_v2 = vpop.permute.xlu1 %976 }
  0xa7   :  { %v1715_v3 = vpop.permute.xlu0 %971  ;;  %v1717_v4 = vpop.permute.xlu1 %1002 }
  0xa8   :  { %2224 = vst [vmem:[#allocation3_spill] sm:$0xff] %v1715_v3  ;;  %2225 = vst [vmem:[#allocation4_spill] sm:$0xff] %v1717_v4 }
  0xab   :  { %v1719_v5 = vpop.permute.xlu0 %997  ;;  %v1721_v6 = vpop.permute.xlu1 %1028 }
  0xaf   :  { %v1728_v8 = vpop.permute.xlu0 %1007  ;;  %v1730_v9 = vpop.permute.xlu1 %1038 }
  0xb3   :  { %v1765_v35 = vpop.permute.xlu0 %1033  ;;  %v1767_v36 = vpop.permute.xlu1 %1064 }
  0xb4   :  { %2226 = vst [vmem:[#allocation5_spill] sm:$0xff] %v1765_v35  ;;  %2227 = vst [vmem:[#allocation6_spill] sm:$0xff] %v1767_v36 }
  0xdc   :  { %v1386_v11 = vpop.f32.mrb[0].mxu0  ;;  %v1392_v12 = vpop.f32.mrb[0].mxu1 }
  0xdd   :  { %v105_v13 = vmul.f32 %v1386_v11, %v1726_v7  ;;  %v189_v14 = vmul.f32 %v1392_v12, %v1726_v7  ;;  %v83_v15 = vpop.f32.mrb[1].mxu0  ;;  %v173_v16 = vpop.f32.mrb[1].mxu1 }
  0xde   :  { %v103_v17 = vmul.f32 %v1726_v7, %v83_v15  ;;  %v187_v18 = vmul.f32 %v1726_v7, %v173_v16  ;;  %v1387_v19 = vpop.f32.mrb[2].mxu0  ;;  %v1393_v20 = vpop.f32.mrb[2].mxu1 }
  0xdf   :  { %v1742_v21 = vadd.f32 %v1735_v10, %v105_v13  ;;  %v1745_v22 = vadd.f32 %v1735_v10, %v189_v14  ;;  %v86_v23 = vpop.f32.mrb[3].mxu0  ;;  %v176_v24 = vpop.f32.mrb[3].mxu1 }
  0xe0   :  { %v1748_v25 = vadd.f32 %v1735_v10, %v103_v17  ;;  %v1751_v26 = vadd.f32 %v1735_v10, %v187_v18  ;;  %v104_v27 = vmul.f32 %v1726_v7, %v86_v23  ;;  %v188_v28 = vmul.f32 %v1726_v7, %v176_v24  ;;  %v1811_v23 = vpop.permute.xlu0 %1059  ;;  %v1813_v24 = vpop.permute.xlu1 %1090 }
  0xe1   :  { %v2216_v29 = vmax.f32 %v1742_v21, 0.0  ;;  %v2212_v30 = vmax.f32 %v1745_v22, 0.0 }
  0xe2   :  { %v2206_v31 = vmax.f32 %v1748_v25, 0.0  ;;  %v2205_v32 = vmax.f32 %v1751_v26, 0.0  ;;  %v1760_v33 = vadd.f32 %v1735_v10, %v104_v27  ;;  %v1763_v34 = vadd.f32 %v1735_v10, %v188_v28 }
  0xe3   :  { %v202_v37 = vmax.f32 %v2216_v29, %v2212_v30 }
  0xe4   :  { %v200_v38 = vmax.f32 %v2206_v31, %v2205_v32  ;;  %v2202_v39 = vmax.f32 %v1760_v33, 0.0  ;;  %v2199_v40 = vmax.f32 %v1763_v34, 0.0  ;;  %v1398_v41 = vpop.f32.mrb[4].mxu0  ;;  %v1404_v42 = vpop.f32.mrb[4].mxu1 }
  0xe5   :  { %v271_v43 = vmul.f32 %v1398_v41, %v1726_v7  ;;  %v353_v44 = vmul.f32 %v1404_v42, %v1726_v7  ;;  %v255_v45 = vpop.f32.mrb[5].mxu0  ;;  %v337_v46 = vpop.f32.mrb[5].mxu1 }
  0xe6   :  { %v201_v47 = vmax.f32 %v2202_v39, %v2199_v40  ;;  %v269_v48 = vmul.f32 %v1726_v7, %v255_v45  ;;  %v351_v49 = vmul.f32 %v1726_v7, %v337_v46  ;;  %v1399_v50 = vpop.f32.mrb[6].mxu0  ;;  %v1405_v51 = vpop.f32.mrb[6].mxu1 }
  0xe7   :  { %v1788_v52 = vadd.f32 %v1735_v10, %v271_v43  ;;  %v1791_v53 = vadd.f32 %v1735_v10, %v353_v44  ;;  %v258_v54 = vpop.f32.mrb[7].mxu0  ;;  %v340_v55 = vpop.f32.mrb[7].mxu1 }
  0xe8   :  { %v1794_v11 = vadd.f32 %v1735_v10, %v269_v48  ;;  %v1797_v12 = vadd.f32 %v1735_v10, %v351_v49  ;;  %v270_v13 = vmul.f32 %v1726_v7, %v258_v54  ;;  %v352_v14 = vmul.f32 %v1726_v7, %v340_v55 }
  0xe9   :  { %v2210_v15 = vmax.f32 %v1788_v52, 0.0  ;;  %v2209_v16 = vmax.f32 %v1791_v53, 0.0 }
  0xea   :  { %v2204_v17 = vmax.f32 %v1794_v11, 0.0  ;;  %v2203_v18 = vmax.f32 %v1797_v12, 0.0  ;;  %v1806_v19 = vadd.f32 %v1735_v10, %v270_v13  ;;  %v1809_v20 = vadd.f32 %v1735_v10, %v352_v14 }
  0xeb   :  { %v284_v27 = vmax.f32 %v202_v37, %v2210_v15 }
  0xec   :  { %v282_v28 = vmax.f32 %v200_v38, %v2204_v17  ;;  %v2201_v41 = vmax.f32 %v1806_v19, 0.0  ;;  %v1410_v42 = vpop.f32.mrb[8].mxu0  ;;  %v1416_v43 = vpop.f32.mrb[8].mxu1  ;;  %v2200_v45 = vmax.f32 %v1809_v20, 0.0 }
  0xed   :  { %v366_v44 = vmax.f32 %v284_v27, %v2209_v16  ;;  %v435_v46 = vmul.f32 %v1410_v42, %v1726_v7  ;;  %v517_v48 = vmul.f32 %v1416_v43, %v1726_v7  ;;  %v419_v49 = vpop.f32.mrb[9].mxu0  ;;  %v501_v50 = vpop.f32.mrb[9].mxu1 }
  0xee   :  { %v364_v37 = vmax.f32 %v282_v28, %v2203_v18  ;;  %v283_v38 = vmax.f32 %v201_v47, %v2201_v41  ;;  %v433_v51 = vmul.f32 %v1726_v7, %v419_v49  ;;  %v515_v54 = vmul.f32 %v1726_v7, %v501_v50  ;;  %v1411_v55 = vpop.f32.mrb[10].mxu0  ;;  %v1417_v13 = vpop.f32.mrb[10].mxu1 }
  0xef   :  { %v1832_v14 = vadd.f32 %v1735_v10, %v435_v46  ;;  %v1835_v27 = vadd.f32 %v1735_v10, %v517_v48  ;;  %v422_v42 = vpop.f32.mrb[11].mxu0  ;;  %v504_v43 = vpop.f32.mrb[11].mxu1 }
  0xf0   :  { %v365_v28 = vmax.f32 %v283_v38, %v2200_v45  ;;  %v1840_v40 = vadd.f32 %v1735_v10, %v433_v51  ;;  %v1843_v47 = vadd.f32 %v1735_v10, %v515_v54  ;;  %v434_v49 = vmul.f32 %v1726_v7, %v422_v42  ;;  %v1854_v51 = vpop.permute.xlu0 %1069  ;;  %v1856_v45 = vpop.permute.xlu1 %1100 }
  0xf1   :  { %v2207_v50 = vmax.f32 %v1832_v14, 0.0  ;;  %v2211_v46 = vmax.f32 %v1835_v27, 0.0  ;;  %v516_v48 = vmul.f32 %v1726_v7, %v504_v43 }
  0xf2   :  { %v2208_v55 = vmax.f32 %v1840_v40, 0.0  ;;  %v2213_v13 = vmax.f32 %v1843_v47, 0.0  ;;  %v1852_v38 = vadd.f32 %v1735_v10, %v434_v49 }
  0xf3   :  { %v448_v54 = vmax.f32 %v366_v44, %v2207_v50  ;;  %v1861_v42 = vadd.f32 %v1735_v10, %v516_v48 }
  0xf4   :  { %2228 = vst [vmem:[#allocation7_spill] sm:$0xff] %v1852_v38  ;;  %v446_v43 = vmax.f32 %v364_v37, %v2208_v55  ;;  %v2215_v41 = vmax.f32 %v1852_v38, 0.0  ;;  %v1422_v39 = vpop.f32.mrb[12].mxu0  ;;  %v1428_v18 = vpop.f32.mrb[12].mxu1 }
  0xf5   :  { %2229 = vst [vmem:[#allocation8_spill] sm:$0xff] %v1861_v42  ;;  %v530_v49 = vmax.f32 %v448_v54, %v2211_v46  ;;  %v2214_v17 = vmax.f32 %v1861_v42, 0.0  ;;  %v599_v32 = vmul.f32 %v1422_v39, %v1726_v7  ;;  %v681_v31 = vmul.f32 %v1428_v18, %v1726_v7  ;;  %v583_v44 = vpop.f32.mrb[13].mxu0  ;;  %v665_v50 = vpop.f32.mrb[13].mxu1 }
  0xf6   :  { %v528_v48 = vmax.f32 %v446_v43, %v2213_v13  ;;  %v447_v37 = vmax.f32 %v365_v28, %v2215_v41  ;;  %v597_v55 = vmul.f32 %v1726_v7, %v583_v44  ;;  %v679_v16 = vmul.f32 %v1726_v7, %v665_v50  ;;  %v1423_v15 = vpop.f32.mrb[14].mxu0  ;;  %v1429_v54 = vpop.f32.mrb[14].mxu1 }
  0xf7   :  { %v1878_v46 = vadd.f32 %v1735_v10, %v599_v32  ;;  %v1881_v39 = vadd.f32 %v1735_v10, %v681_v31  ;;  %v586_v18 = vpop.f32.mrb[15].mxu0  ;;  %v668_v30 = vpop.f32.mrb[15].mxu1  ;;  %v859_v41 = vlaneseq }
  0xf8   :  { %v529_v43 = vmax.f32 %v447_v37, %v2214_v17  ;;  %v1886_v13 = vadd.f32 %v1735_v10, %v597_v55  ;;  %v1889_v28 = vadd.f32 %v1735_v10, %v679_v16  ;;  %v598_v15 = vmul.f32 %v1726_v7, %v586_v18  ;;  %v1900_v55 = vpop.permute.xlu0 %1095  ;;  %v1902_v17 = vpop.permute.xlu1 %1126 }
  0xf9   :  { %v2217_v50 = vmax.f32 %v1878_v46, 0.0  ;;  %v680_v31 = vmul.f32 %v1726_v7, %v668_v30  ;;  %2230 = vst [vmem:[#allocation9_spill] sm:$0xff] %v1900_v55  ;;  %2231 = vst [vmem:[#allocation10_spill] sm:$0xff] %v1902_v17  ;;  %v1925_v55 = vand.u32 127, %v859_v41 }
  0xfa   :  { %v2218_v44 = vmax.f32 %v1886_v13, 0.0  ;;  %v1898_v37 = vadd.f32 %v1735_v10, %v598_v15  ;;  %v2232_v15 = vmax.f32 %v1881_v39, 0.0  ;;  %v2233_v35 = vmax.f32 %v1889_v28, 0.0 }
  0xfb   :  { %v612_v16 = vmax.f32 %v530_v49, %v2217_v50  ;;  %v1907_v18 = vadd.f32 %v1735_v10, %v680_v31  ;;  %vm861_vm3 = vcmp.lt.s32.totalorder %v1925_v55, 16 }
  0xfc   :  { %v610_v30 = vmax.f32 %v528_v48, %v2218_v44  ;;  %v2221_v29 = vmax.f32 %v1898_v37, 0.0  ;;  %v1434_v54 = vpop.f32.mrb[16].mxu0  ;;  %v1440_v32 = vpop.f32.mrb[16].mxu1 }
  0xfd   :  { %v694_v36 = vmax.f32 %v612_v16, %v2232_v15  ;;  %v763_v17 = vmul.f32 %v1434_v54, %v1726_v7  ;;  %v845_v49 = vmul.f32 %v1440_v32, %v1726_v7  ;;  %v747_v50 = vpop.f32.mrb[17].mxu0  ;;  %v829_v31 = vpop.f32.mrb[17].mxu1  ;;  %v2234_v62 = vmax.f32 %v1907_v18, 0.0 }
  0xfe   :  { %v692_v4 = vmax.f32 %v610_v30, %v2233_v35  ;;  %v611_v48 = vmax.f32 %v529_v43, %v2221_v29  ;;  %v761_v44 = vmul.f32 %v1726_v7, %v747_v50  ;;  %v843_v42 = vmul.f32 %v1726_v7, %v829_v31  ;;  %v1435_v38 = vpop.f32.mrb[18].mxu0  ;;  %v1441_v16 = vpop.f32.mrb[18].mxu1 }
  0xff   :  { %v766_v15 = vadd.f32 %v1735_v10, %v763_v17  ;;  %v848_v54 = vadd.f32 %v1735_v10, %v845_v49  ;;  %v750_v32 = vpop.f32.mrb[19].mxu0  ;;  %v832_v3 = vpop.f32.mrb[19].mxu1  ;;  %v2238_v29 = vmax.f32 %v1791_v53, 0.0 }
 0x100   :  { %v693_v35 = vmax.f32 %v611_v48, %v2234_v62  ;;  %v1930_v30 = vadd.f32 %v1735_v10, %v761_v44  ;;  %v1933_v43 = vadd.f32 %v1735_v10, %v843_v42  ;;  %v762_v38 = vmul.f32 %v1726_v7, %v750_v32 }
 0x101   :  { %v769_v50 = vmax.f32 %v766_v15, 0.0  ;;  %v851_v31 = vmax.f32 %v848_v54, 0.0  ;;  %v844_v17 = vmul.f32 %v1726_v7, %v832_v3  ;;  %v1949_v15 = vpop.permute.xlu0 %1121  ;;  %v1951_v3 = vpop.permute.xlu1 %1152  ;;  %v2235_v32 = vmax.f32 %v1742_v21, 0.0 }
 0x102   :  { %v767_v41 = vmax.f32 %v1930_v30, 0.0  ;;  %v849_v49 = vmax.f32 %v1933_v43, 0.0  ;;  %v1940_v16 = vadd.f32 %v1735_v10, %v762_v38  ;;  %v2236_v38 = vmax.f32 %v1745_v22, 0.0 }
 0x103   :  { %v776_v62 = vmax.f32 %v694_v36, %v769_v50  ;;  %v1943_v44 = vadd.f32 %v1735_v10, %v844_v17  ;;  %v2252_v43 = vmax.f32 %v1763_v34, 0.0  ;;  %v2256_v34 = vld [vmem:[#allocation3_spill] sm:$0xff] }
 0x104   :  { %v774_v42 = vmax.f32 %v692_v4, %v767_v41  ;;  %v2222_v48 = vmax.f32 %v1940_v16, 0.0 }
 0x105   :  { %v858_v7 = vmax.f32 %v776_v62, %v851_v31  ;;  %v850_v10 = vmax.f32 %v1943_v44, 0.0  ;;  %v2237_v62 = vmax.f32 %v1788_v52, 0.0 }
 0x106   :  { %v856_v54 = vmax.f32 %v774_v42, %v849_v49  ;;  %v775_v36 = vmax.f32 %v693_v35, %v2222_v48 }
 0x107   :  { %v867_v4 = vsel %vm861_vm3, %v2235_v32, %v858_v7  ;;  %v897_v17 = vsel %vm861_vm3, %v2236_v38, %v858_v7  ;;  %v928_v42 = vsel %vm861_vm3, %v2237_v62, %v858_v7  ;;  %v959_v35 = vsel %vm861_vm3, %v2238_v29, %v858_v7 }
 0x108   :  { %v888_v21 = vmul.f32 %v1693_v56, %v867_v4  ;;  %v919_v48 = vmul.f32 %v1701_v60, %v897_v17  ;;  %v950_v32 = vmul.f32 %v1711_v1, %v928_v42  ;;  %v981_v22 = vmul.f32 %v1713_v2, %v959_v35  ;;  %v1163_v4 = vpop.permute.xlu1 %1162 }
 0x109   :  { %v2239_v38 = vmax.f32 %v1832_v14, 0.0  ;;  %v2240_v62 = vmax.f32 %v1835_v27, 0.0  ;;  %v2241_v29 = vmax.f32 %v1878_v46, 0.0  ;;  %v2242_v60 = vmax.f32 %v1881_v39, 0.0  ;;  %v1132_v39 = vpop.permute.xlu0 %1131 }
 0x10a   :  { %891 = vst [vmem:[%s2198_s5 + $0x10] sm:$0xff] %v888_v21  ;;  %1279 = vst [vmem:[%s2198_s5 + $0x28] sm:$0xff] %v919_v48  ;;  %v1114_v48 = vsel %vm861_vm3, %v769_v50, %v858_v7  ;;  %v1145_v17 = vsel %vm861_vm3, %v851_v31, %v858_v7  ;;  %v2243_v42 = vmax.f32 %v1748_v25, 0.0  ;;  %v2245_v50 = vmax.f32 %v1794_v11, 0.0 }
 0x10b   :  { %v990_v52 = vsel %vm861_vm3, %v2239_v38, %v858_v7  ;;  %v1021_v53 = vsel %vm861_vm3, %v2240_v62, %v858_v7  ;;  %v1052_v56 = vsel %vm861_vm3, %v2241_v29, %v858_v7  ;;  %v1083_v1 = vsel %vm861_vm3, %v2242_v60, %v858_v7  ;;  %1288 = vst [vmem:[%s2198_s5 + $0x40] sm:$0xff] %v950_v32  ;;  %v2255_v29 = vld [vmem:[#allocation2_spill] sm:$0xff] }
 0x10c   :  { %1297 = vst [vmem:[%s2198_s5 + $0x58] sm:$0xff] %v981_v22  ;;  %v1012_v2 = vmul.f32 %v1728_v8, %v990_v52  ;;  %v1043_v14 = vmul.f32 %v1730_v9, %v1021_v53  ;;  %v1074_v27 = vmul.f32 %v1854_v51, %v1052_v56  ;;  %v1105_v46 = vmul.f32 %v1856_v45, %v1083_v1  ;;  %v2257_v1 = vld [vmem:[#allocation7_spill] sm:$0xff] }
 0x10d   :  { %v865_v35 = vsel %vm861_vm3, %v2243_v42, %v856_v54  ;;  %v2244_v8 = vmax.f32 %v1751_v26, 0.0  ;;  %v1136_v25 = vmul.f32 %v1132_v39, %v1114_v48  ;;  %v1167_v26 = vmul.f32 %v1163_v4, %v1145_v17  ;;  %v2264_v4 = vld [vmem:[#allocation5_spill] sm:$0xff]  ;;  %v2265_v17 = vld [vmem:[#allocation6_spill] sm:$0xff] }
 0x10e   :  { %1306 = vst [vmem:[%s2198_s5 + $0x70] sm:$0xff] %v1012_v2  ;;  %1315 = vst [vmem:[%s2198_s5 + $0x88] sm:$0xff] %v1043_v14  ;;  %v886_v45 = vmul.f32 %v1695_v57, %v865_v35  ;;  %v926_v31 = vsel %vm861_vm3, %v2245_v50, %v856_v54  ;;  %v2246_v7 = vmax.f32 %v1797_v12, 0.0  ;;  %v2247_v32 = vmax.f32 %v1840_v40, 0.0  ;;  %v2259_v14 = vld [vmem:[#allocation8_spill] sm:$0xff]  ;;  %v2266_v35 = vld [vmem:[#allocation9_spill] sm:$0xff] }
 0x10f   :  { %v895_v9 = vsel %vm861_vm3, %v2244_v8, %v856_v54  ;;  %1324 = vst [vmem:[%s2198_s5 + $0xa0] sm:$0xff] %v1074_v27  ;;  %1333 = vst [vmem:[%s2198_s5 + $0xb8] sm:$0xff] %v1105_v46  ;;  %v2248_v38 = vmax.f32 %v1843_v47, 0.0  ;;  %v2249_v47 = vmax.f32 %v1886_v13, 0.0  ;;  %v2250_v62 = vmax.f32 %v1889_v28, 0.0 }
 0x110   :  { %v917_v51 = vmul.f32 %v1697_v58, %v895_v9  ;;  %v957_v21 = vsel %vm861_vm3, %v2246_v7, %v856_v54  ;;  %v988_v22 = vsel %vm861_vm3, %v2247_v32, %v856_v54  ;;  %1342 = vst [vmem:[%s2198_s5 + $0xd0] sm:$0xff] %v1136_v25  ;;  %1351 = vst [vmem:[%s2198_s5 + $0xe8] sm:$0xff] %v1167_v26  ;;  %v2258_v2 = vmax.f32 %v2257_v1, 0.0  ;;  %v1158_v9 = vpop.permute.xlu0 %1157 }
 0x111   :  { %v1019_v57 = vsel %vm861_vm3, %v2248_v38, %v856_v54  ;;  %889 = vst [vmem:[%s2198_s5] sm:$0xff] %v886_v45  ;;  %v948_v58 = vmul.f32 %v1707_v63, %v926_v31  ;;  %v979_v40 = vmul.f32 %v1709_v0, %v957_v21  ;;  %v1010_v11 = vmul.f32 %v1719_v5, %v988_v22 }
 0x112   :  { %1277 = vst [vmem:[%s2198_s5 + $0x18] sm:$0xff] %v917_v51  ;;  %v1041_v12 = vmul.f32 %v1721_v6, %v1019_v57  ;;  %v1050_v52 = vsel %vm861_vm3, %v2249_v47, %v856_v54  ;;  %v1081_v53 = vsel %vm861_vm3, %v2250_v62, %v856_v54  ;;  %v1112_v63 = vsel %vm861_vm3, %v767_v41, %v856_v54 }
 0x113   :  { %v1143_v0 = vsel %vm861_vm3, %v849_v49, %v856_v54  ;;  %1286 = vst [vmem:[%s2198_s5 + $0x30] sm:$0xff] %v948_v58  ;;  %1295 = vst [vmem:[%s2198_s5 + $0x48] sm:$0xff] %v979_v40  ;;  %v1072_v5 = vmul.f32 %v1811_v23, %v1050_v52  ;;  %v1103_v6 = vmul.f32 %v1813_v24, %v1081_v53  ;;  %v2251_v23 = vmax.f32 %v1760_v33, 0.0 }
 0x114   :  { %1304 = vst [vmem:[%s2198_s5 + $0x60] sm:$0xff] %v1010_v11  ;;  %1313 = vst [vmem:[%s2198_s5 + $0x78] sm:$0xff] %v1041_v12  ;;  %v1134_v13 = vmul.f32 %v1949_v15, %v1112_v63  ;;  %v1165_v28 = vmul.f32 %v1951_v3, %v1143_v0  ;;  %v857_v30 = vmax.f32 %v775_v36, %v850_v10  ;;  %v2253_v49 = vmax.f32 %v1806_v19, 0.0 }
 0x115   :  { %1322 = vst [vmem:[%s2198_s5 + $0x90] sm:$0xff] %v1072_v5  ;;  %1331 = vst [vmem:[%s2198_s5 + $0xa8] sm:$0xff] %v1103_v6  ;;  %v2254_v3 = vmax.f32 %v1809_v20, 0.0  ;;  %v2260_v27 = vmax.f32 %v2259_v14, 0.0  ;;  %v2261_v46 = vmax.f32 %v1898_v37, 0.0  ;;  %v2263_v37 = vld [vmem:[#allocation4_spill] sm:$0xff] }
 0x116   :  { %1340 = vst [vmem:[%s2198_s5 + $0xc0] sm:$0xff] %v1134_v13  ;;  %1349 = vst [vmem:[%s2198_s5 + $0xd8] sm:$0xff] %v1165_v28  ;;  %v866_v24 = vsel %vm861_vm3, %v2251_v23, %v857_v30  ;;  %v896_v41 = vsel %vm861_vm3, %v2252_v43, %v857_v30  ;;  %v927_v15 = vsel %vm861_vm3, %v2253_v49, %v857_v30  ;;  %v2267_v25 = vmax.f32 %v1940_v16, 0.0  ;;  %v2268_v16 = vld [vmem:[#allocation10_spill] sm:$0xff] }
 0x117   :  { %v958_v54 = vsel %vm861_vm3, %v2254_v3, %v857_v30  ;;  %v887_v33 = vmul.f32 %v1699_v59, %v866_v24  ;;  %v918_v36 = vmul.f32 %v1703_v61, %v896_v41  ;;  %v949_v56 = vmul.f32 %v2255_v29, %v927_v15 }
 0x118   :  { %v980_v60 = vmul.f32 %v2256_v34, %v958_v54  ;;  %v989_v19 = vsel %vm861_vm3, %v2258_v2, %v857_v30  ;;  %v1020_v20 = vsel %vm861_vm3, %v2260_v27, %v857_v30  ;;  %v1051_v59 = vsel %vm861_vm3, %v2261_v46, %v857_v30 }
 0x119   :  { %v2262_v61 = vmax.f32 %v1907_v18, 0.0  ;;  %890 = vst [vmem:[%s2198_s5 + $0x8] sm:$0xff] %v887_v33  ;;  %1278 = vst [vmem:[%s2198_s5 + $0x20] sm:$0xff] %v918_v36  ;;  %v1011_v18 = vmul.f32 %v2263_v37, %v989_v19  ;;  %v1042_v48 = vmul.f32 %v2264_v4, %v1020_v20  ;;  %v1073_v42 = vmul.f32 %v2265_v17, %v1051_v59 }
 0x11a   :  { %1287 = vst [vmem:[%s2198_s5 + $0x38] sm:$0xff] %v949_v56  ;;  %1296 = vst [vmem:[%s2198_s5 + $0x50] sm:$0xff] %v980_v60  ;;  %v1113_v26 = vsel %vm861_vm3, %v2267_v25, %v857_v30  ;;  %v1144_v45 = vsel %vm861_vm3, %v850_v10, %v857_v30 }
 0x11b   :  { %v1082_v39 = vsel %vm861_vm3, %v2262_v61, %v857_v30  ;;  %1305 = vst [vmem:[%s2198_s5 + $0x68] sm:$0xff] %v1011_v18  ;;  %1314 = vst [vmem:[%s2198_s5 + $0x80] sm:$0xff] %v1042_v48  ;;  %v1135_v44 = vmul.f32 %v2268_v16, %v1113_v26  ;;  %v1166_v55 = vmul.f32 %v1158_v9, %v1144_v45 }
 0x11c   :  { %v1104_v8 = vmul.f32 %v2266_v35, %v1082_v39  ;;  %1323 = vst [vmem:[%s2198_s5 + $0x98] sm:$0xff] %v1073_v42 }
 0x11d   :  { %1341 = vst [vmem:[%s2198_s5 + $0xc8] sm:$0xff] %v1135_v44  ;;  %1350 = vst [vmem:[%s2198_s5 + $0xe0] sm:$0xff] %v1166_v55 }
 0x11e   :  { %1332 = vst [vmem:[%s2198_s5 + $0xb0] sm:$0xff] %v1104_v8 }

</bundles_post_ra>
